<compile_context>
chip_gen: v7x
topology: tpu7x:2x2x1
jax: 0.10.0
libtpu: 0.0.40
codegen_flags: <defaults>
</compile_context>

<pallas_src>
import math

import jax
import jax.numpy as jnp
from jax import lax
from jax.experimental import pallas as pl
from jax.experimental.pallas import tpu as pltpu


def _bimatch_lstm_kernel(
    p2_ref, mp2_ref, q_ref, mq_ref,
    Wq_ref, wv_ref,
    Wp_all_ref, Wh_all_ref, Wz_all_ref, b9_ref,
    out_f_ref, out_b_ref, last_ref,
    pg_scr, gq_scr, h_scr, c_scr,
):
    Tc, _, Bt, P = p2_ref.shape          # one time chunk, explicit direction axis
    _, Tq, Q = q_ref.shape
    H = Wh_all_ref.shape[0]
    H4, H8 = 4 * H, 8 * H
    B2 = 2 * Bt                          # rows: [:Bt] forward, [Bt:] backward
    f32 = jnp.float32
    tc = pl.program_id(1)

    # ---------------- once per batch tile: Gq = q @ W_q, state init ----------
    @pl.when(tc == 0)
    def _():
        gq = jnp.dot(q_ref[...].reshape(Bt * Tq, Q), Wq_ref[...],
                     preferred_element_type=f32)
        gq_scr[...] = gq.reshape(Bt, Tq, H)
        h_scr[...] = jnp.zeros_like(h_scr)
        c_scr[...] = jnp.zeros_like(c_scr)

    # ------------- once per time chunk: all p projections, both dirs ---------
    # columns = [p@W_ihp_f + b_f (4H) | p@W_ihp_b + b_b (4H) | p@W_p + b_att (H)]
    # Biases are folded in here so the per-step serial path has no bias add.
    pg = jnp.dot(p2_ref[...].reshape(Tc * B2, P), Wp_all_ref[...],
                 preferred_element_type=f32) + b9_ref[...]
    pg_scr[...] = pg.reshape(Tc, B2, 9 * H)

    # ------------- loop-invariant loads (hoisted out of the recurrence) ------
    Gq = gq_scr[...]                     # (Bt, Tq, H)
    q = q_ref[...]                       # (Bt, Tq, Q)   shared by both directions
    mq = mq_ref[...][None]               # (1, Bt, Tq)
    wv = wv_ref[...].reshape(1, 1, 1, H)
    Wh_all = Wh_all_ref[...]             # (H, 9H) = [W_hh_f | W_hh_b | W_r]
    Wz_all = Wz_all_ref[...]             # (Q, 8H) = [W_ihz_f | W_ihz_b]

    def step(lt, carry):
        h, c = carry                     # (2Bt, H): [:Bt] fwd, [Bt:] bwd
        pgt = pg_scr[lt]                 # (2Bt, 9H) — biases already folded in
        m = mp2_ref[lt].reshape(B2, 1)   # (2Bt, 1)  mask_p (fwd / flipped)

        # One matmul for every h-dependent projection of both directions.
        hp = jnp.dot(h, Wh_all, preferred_element_type=f32)          # (2Bt, 9H)

        # ---- shared Match-LSTM attention, both directions at once ----
        att = (pgt[:, H8:] + hp[:, H8:]).reshape(2, Bt, 1, H)
        G = jnp.tanh(Gq[None] + att)                                  # (2,Bt,Tq,H)
        s = jnp.sum(G * wv, axis=-1)                                  # (2,Bt,Tq)
        # c_att would add the same scalar to every logit -> softmax-invariant.
        s = s - jnp.max(s, axis=-1, keepdims=True)
        e = jnp.exp(s) * mq                                           # (2,Bt,Tq)
        # Unnormalized context on the MXU; normalization deferred so the divide
        # is off the matmul input path and scales (., Q) instead of (., Tq).
        z = jnp.einsum("dbt,btq->dbq", e, q,
                       preferred_element_type=f32)                    # (2,Bt,Q)
        inv = pl.reciprocal(jnp.sum(e, axis=-1, keepdims=True) + 1e-6,
                            approx=False)
        z = (z * inv).reshape(B2, Q)

        # ---- two LSTM cells (independent weights); gate layout [i|f|o|g] ----
        gz = jnp.dot(z, Wz_all, preferred_element_type=f32)           # (2Bt, 8H)
        g_f = pgt[:Bt, :H4] + hp[:Bt, :H4] + gz[:Bt, :H4]
        g_b = pgt[Bt:, H4:H8] + hp[Bt:, H4:H8] + gz[Bt:, H4:H8]
        gates = jnp.concatenate([g_f, g_b], axis=0)                   # (2Bt, 4H)
        sig = jax.nn.sigmoid(gates[:, :3 * H])                        # 1 EUP pass
        i_g = sig[:, :H]
        f_g = sig[:, H:2 * H]
        o_g = sig[:, 2 * H:]
        g_g = jnp.tanh(gates[:, 3 * H:])                              # 1 EUP pass
        c_new = f_g * c + i_g * g_g
        h_new = o_g * jnp.tanh(c_new)

        keep = m > 0.0                   # single select per state
        h = jnp.where(keep, h_new, h)
        c = jnp.where(keep, c_new, c)

        hm = h * m                       # module multiplies stored states by mask_p
        out_f_ref[lt] = hm[:Bt]
        out_b_ref[Tc - 1 - lt] = hm[Bt:]     # un-flip within the chunk
        return h, c

    h_fin, c_fin = lax.fori_loop(0, Tc, step, (h_scr[...], c_scr[...]))
    h_scr[...] = h_fin                   # carry state to the next chunk
    c_scr[...] = c_fin
    # Resident accumulator block across the time axis; final chunk's value wins.
    last_ref[...] = jnp.concatenate([h_fin[:Bt], h_fin[Bt:]], axis=-1)


def _reorder_gate_cols(w, H):
    """PyTorch LSTM gate columns (i,f,g,o) -> (i,f,o,g): sigmoid gates contiguous."""
    return jnp.concatenate(
        [w[..., :2 * H], w[..., 3 * H:4 * H], w[..., 2 * H:3 * H]], axis=-1)


def init_params(key, P, Q, H):
    """Deterministic synthetic parameters.  b_f / b_b stand in for b_ih + b_hh."""
    ks = jax.random.split(key, 12)
    u = lambda k, shape, s=0.1: jax.random.uniform(k, shape, jnp.float32, -s, s)
    return dict(
        W_p=u(ks[0], (P, H)), W_q=u(ks[1], (Q, H)), W_r=u(ks[2], (H, H)),
        w=u(ks[3], (1, H)), b_att=u(ks[4], (1, H)), c_att=u(ks[5], (1, 1)),
        W_ih_f=u(ks[6], (P + Q, 4 * H)), W_hh_f=u(ks[7], (H, 4 * H)),
        b_f=u(ks[8], (1, 4 * H)),
        W_ih_b=u(ks[9], (P + Q, 4 * H)), W_hh_b=u(ks[10], (H, 4 * H)),
        b_b=u(ks[11], (1, 4 * H)),
    )


def bimatch_lstm(input_p, mask_p, input_q, mask_q, params,
                 *, batch_tile=None, time_chunk=None):
    """Matches BiMatchLSTM.forward: returns (concat_states, concat_last_state)."""
    B, Tp, P = input_p.shape
    _, Tq, Q = input_q.shape
    H = params["W_r"].shape[0]
    f32 = jnp.float32

    Bt = B if batch_tile is None else batch_tile
    Tc = Tp if time_chunk is None else time_chunk
    # TODO(synk): pad Tp / B instead of requiring exact divisibility.
    assert Tp % Tc == 0 and B % Bt == 0
    n_b, n_tc = B // Bt, Tp // Tc

    # Time-major inputs with an explicit direction axis: batch tiling always
    # picks the forward AND backward rows of the same batch slice.
    p_t = jnp.transpose(input_p, (1, 0, 2)).astype(f32)            # (Tp, B, P)
    p2 = jnp.stack([p_t, p_t[::-1]], axis=1)                       # (Tp, 2, B, P)
    mp_t = jnp.transpose(mask_p, (1, 0)).astype(f32)               # (Tp, B)
    mp2 = jnp.stack([mp_t, mp_t[::-1]], axis=1)[..., None]         # (Tp, 2, B, 1)

    # Fused, lane-aligned weight layouts: [fwd gates 4H | bwd gates 4H | att H],
    # gate order (i,f,o,g); biases fused into a single 9H row.
    Wihp_f, Wihz_f = params["W_ih_f"][:P], params["W_ih_f"][P:]
    Wihp_b, Wihz_b = params["W_ih_b"][:P], params["W_ih_b"][P:]
    ro = lambda w: _reorder_gate_cols(w, H)
    Wp_all = jnp.concatenate([ro(Wihp_f), ro(Wihp_b), params["W_p"]], axis=1)
    Wh_all = jnp.concatenate([ro(params["W_hh_f"]), ro(params["W_hh_b"]),
                              params["W_r"]], axis=1)
    Wz_all = jnp.concatenate([ro(Wihz_f), ro(Wihz_b)], axis=1)
    b9 = jnp.concatenate([ro(params["b_f"]), ro(params["b_b"]),
                          params["b_att"]], axis=1)
    # c_att is softmax-invariant -> intentionally not passed to the kernel.

    def nbytes(*shapes):
        return sum(4 * math.prod(s) for s in shapes)

    scratch_bytes = nbytes((Tc, 2 * Bt, 9 * H), (Bt, Tq, H),
                           (2 * Bt, H), (2 * Bt, H))
    block_bytes = nbytes((Tc, 2, Bt, P), (Tc, 2, Bt, 1), (Bt, Tq, Q), (Bt, Tq),
                         (Q, H), (1, H), (P, 9 * H), (H, 9 * H), (Q, 8 * H),
                         (1, 9 * H), (Tc, Bt, H), (Tc, Bt, H), (Bt, 2 * H))
    vmem_limit = int(min((32 << 20) + scratch_bytes + 2 * block_bytes, 64 << 20))

    out_f, out_b, last = pl.pallas_call(
        _bimatch_lstm_kernel,
        out_shape=(jax.ShapeDtypeStruct((Tp, B, H), f32),
                   jax.ShapeDtypeStruct((Tp, B, H), f32),
                   jax.ShapeDtypeStruct((B, 2 * H), f32)),
        grid=(n_b, n_tc),
        in_specs=[
            pl.BlockSpec((Tc, 2, Bt, P), lambda b, t: (t, 0, b, 0)),   # p (both dirs)
            pl.BlockSpec((Tc, 2, Bt, 1), lambda b, t: (t, 0, b, 0)),   # mask_p
            pl.BlockSpec((Bt, Tq, Q), lambda b, t: (b, 0, 0)),         # q
            pl.BlockSpec((Bt, Tq), lambda b, t: (b, 0)),               # mask_q
            pl.BlockSpec((Q, H), lambda b, t: (0, 0)),                 # W_q
            pl.BlockSpec((1, H), lambda b, t: (0, 0)),                 # w (att vector)
            pl.BlockSpec((P, 9 * H), lambda b, t: (0, 0)),             # W_p_all
            pl.BlockSpec((H, 9 * H), lambda b, t: (0, 0)),             # W_h_all
            pl.BlockSpec((Q, 8 * H), lambda b, t: (0, 0)),             # W_z_all
            pl.BlockSpec((1, 9 * H), lambda b, t: (0, 0)),             # bias9
        ],
        out_specs=(
            pl.BlockSpec((Tc, Bt, H), lambda b, t: (t, b, 0)),             # fwd states
            pl.BlockSpec((Tc, Bt, H), lambda b, t: (n_tc - 1 - t, b, 0)),  # bwd states
            pl.BlockSpec((Bt, 2 * H), lambda b, t: (b, 0)),                # last state
        ),
        scratch_shapes=[
            pltpu.VMEM((Tc, 2 * Bt, 9 * H), jnp.float32),  # per-chunk p projections
            pltpu.VMEM((Bt, Tq, H), jnp.float32),          # Gq (persists per tile)
            pltpu.VMEM((2 * Bt, H), jnp.float32),          # h carried across chunks
            pltpu.VMEM((2 * Bt, H), jnp.float32),          # c carried across chunks
        ],
        compiler_params=pltpu.CompilerParams(
            dimension_semantics=("parallel", "arbitrary"),
            vmem_limit_bytes=vmem_limit),
    )(p2, mp2, input_q.astype(f32), mask_q.astype(f32),
      params["W_q"], params["w"], Wp_all, Wh_all, Wz_all, b9)

    states = jnp.transpose(jnp.concatenate([out_f, out_b], axis=-1), (1, 0, 2))
    return states, last


def _reference(input_p, mask_p, input_q, mask_q, params):
    """Pure-JAX re-implementation of BiMatchLSTM.forward (for verification)."""
    B, Tp, P = input_p.shape
    H = params["W_r"].shape[0]
    q = input_q.astype(jnp.float32)
    mask_q = mask_q.astype(jnp.float32)
    mask_p = mask_p.astype(jnp.float32)
    Gq = jnp.einsum("btq,qh->bth", q, params["W_q"])

    def attention(p_t, h):
        Gp = p_t @ params["W_p"]
        Gr = h @ params["W_r"]
        G = jnp.tanh(Gq + (Gp + Gr + params["b_att"])[:, None, :])
        s = jnp.sum(G * params["w"][None], axis=-1) + params["c_att"]
        s = s - jnp.max(s, axis=-1, keepdims=True)
        e = jnp.exp(s) * mask_q
        a = e / (jnp.sum(e, axis=-1, keepdims=True) + 1e-6)
        z = jnp.sum(a[:, :, None] * q, axis=1)
        return jnp.concatenate([p_t, z], axis=-1)

    def cell(x, h, c, Wih, Whh, b):
        g = x @ Wih + h @ Whh + b
        i = jax.nn.sigmoid(g[:, :H]); f = jax.nn.sigmoid(g[:, H:2 * H])
        gg = jnp.tanh(g[:, 2 * H:3 * H]); o = jax.nn.sigmoid(g[:, 3 * H:])
        c2 = f * c + i * gg
        return o * jnp.tanh(c2), c2

    def run(p, mp, Wih, Whh, b):
        h = jnp.zeros((B, H), jnp.float32); c = jnp.zeros((B, H), jnp.float32)
        outs = []
        for t in range(Tp):
            m = mp[:, t:t + 1]
            x = attention(p[:, t].astype(jnp.float32), h)
            nh, nc = cell(x, h, c, Wih, Whh, b)
            h = nh * m + h * (1 - m); c = nc * m + c * (1 - m)
            outs.append(h)
        return jnp.stack(outs, 1), h

    fs, hf = run(input_p, mask_p, params["W_ih_f"], params["W_hh_f"], params["b_f"])
    bs, hb = run(input_p[:, ::-1], mask_p[:, ::-1],
                 params["W_ih_b"], params["W_hh_b"], params["b_b"])
    bs = bs[:, ::-1]
    states = jnp.concatenate([fs, bs], axis=-1) * mask_p[:, :, None]
    last = jnp.concatenate([hf, hb], axis=-1)
    return states, last


if __name__ == "__main__":
    key = jax.random.PRNGKey(0)
    B, Tp, Tq, H = 2, 8, 6, 32
    P = Q = 2 * 16  # input_p_dim = input_q_dim = hidden_size * 2 (per docstring)

    k_p, k_q, k_params = jax.random.split(key, 3)
    input_p = jax.random.normal(k_p, (B, Tp, P), jnp.float32)
    input_q = jax.random.normal(k_q, (B, Tq, Q), jnp.float32)
    lengths_p = jnp.array([Tp, Tp - 3], jnp.int32)
    lengths_q = jnp.array([Tq, Tq - 2], jnp.int32)
    mask_p = (jnp.arange(Tp)[None, :] < lengths_p[:, None]).astype(jnp.float32)
    mask_q = (jnp.arange(Tq)[None, :] < lengths_q[:, None]).astype(jnp.float32)

    params = init_params(k_params, P, Q, H)

    # time_chunk=4 exercises the Tp grid axis (2 chunks) + cross-chunk state carry.
    run = jax.jit(lambda p, mp, q, mq, prm:
                  bimatch_lstm(p, mp, q, mq, prm, time_chunk=4))
    states, last_state = run(input_p, mask_p, input_q, mask_q, params)
    jax.block_until_ready((states, last_state))

    assert states.shape == (B, Tp, 2 * H), states.shape
    assert last_state.shape == (B, 2 * H), last_state.shape
    assert bool(jnp.all(jnp.isfinite(states))) and bool(jnp.all(jnp.isfinite(last_state)))

    with jax.default_matmul_precision("highest"):
        ref_states, ref_last = _reference(input_p, mask_p, input_q, mask_q, params)
    assert bool(jnp.allclose(states, ref_states, atol=1e-3, rtol=1e-3))
    assert bool(jnp.allclose(last_state, ref_last, atol=1e-3, rtol=1e-3))

    print("KERNEL_OK")
</pallas_src>

<mosaic_0001>
module attributes {stable_mosaic.version = 11 : i64} {
  func.func @_bimatch_lstm_kernel(%arg0: i32, %arg1: i32, %arg2: memref<4x2x2x32xf32, #tpu.memory_space<vmem>>, %arg3: memref<4x2x2x1xf32, #tpu.memory_space<vmem>>, %arg4: memref<2x6x32xf32, #tpu.memory_space<vmem>>, %arg5: memref<2x6xf32, #tpu.memory_space<vmem>>, %arg6: memref<32x32xf32, #tpu.memory_space<vmem>>, %arg7: memref<1x32xf32, #tpu.memory_space<vmem>>, %arg8: memref<32x288xf32, #tpu.memory_space<vmem>>, %arg9: memref<32x288xf32, #tpu.memory_space<vmem>>, %arg10: memref<32x256xf32, #tpu.memory_space<vmem>>, %arg11: memref<1x288xf32, #tpu.memory_space<vmem>>, %arg12: memref<4x2x32xf32, #tpu.memory_space<vmem>>, %arg13: memref<4x2x32xf32, #tpu.memory_space<vmem>>, %arg14: memref<2x64xf32, #tpu.memory_space<vmem>>, %arg15: memref<4x4x288xf32, #tpu.memory_space<vmem>>, %arg16: memref<2x6x32xf32, #tpu.memory_space<vmem>>, %arg17: memref<4x32xf32, #tpu.memory_space<vmem>>, %arg18: memref<4x32xf32, #tpu.memory_space<vmem>>) attributes {dimension_semantics = [#tpu.dimension_semantics<parallel>, #tpu.dimension_semantics<arbitrary>], iteration_bounds = array<i64: 1, 2>, scalar_prefetch = 0 : i64, scratch_operands = 4 : i64, tpu.core_type = #tpu.core_type<tc>, window_params = [{transform_indices = @transform_0, window_bounds = array<i64: 4, 2, 2, 32>}, {transform_indices = @transform_1, window_bounds = array<i64: 4, 2, 2, 1>}, {transform_indices = @transform_2, window_bounds = array<i64: 2, 6, 32>}, {transform_indices = @transform_3, window_bounds = array<i64: 2, 6>}, {pipeline_mode = #tpu.pipeline_mode<synchronous>, transform_indices = @transform_4, window_bounds = array<i64: 32, 32>}, {pipeline_mode = #tpu.pipeline_mode<synchronous>, transform_indices = @transform_5, window_bounds = array<i64: 1, 32>}, {pipeline_mode = #tpu.pipeline_mode<synchronous>, transform_indices = @transform_6, window_bounds = array<i64: 32, 288>}, {pipeline_mode = #tpu.pipeline_mode<synchronous>, transform_indices = @transform_7, window_bounds = array<i64: 32, 288>}, {pipeline_mode = #tpu.pipeline_mode<synchronous>, transform_indices = @transform_8, window_bounds = array<i64: 32, 256>}, {pipeline_mode = #tpu.pipeline_mode<synchronous>, transform_indices = @transform_9, window_bounds = array<i64: 1, 288>}, {transform_indices = @transform_10, window_bounds = array<i64: 4, 2, 32>}, {transform_indices = @transform_11, window_bounds = array<i64: 4, 2, 32>}, {transform_indices = @transform_12, window_bounds = array<i64: 2, 64>}]} {
    %c0_i32 = arith.constant 0 : i32
    %0 = arith.cmpi eq, %arg1, %c0_i32 : i32
    %1 = arith.extui %0 : i1 to i32
    %c0_i32_0 = arith.constant 0 : i32
    %2 = arith.cmpi ne, %1, %c0_i32_0 : i32
    scf.if %2 {
      %c0_37 = arith.constant 0 : index
      %c0_38 = arith.constant 0 : index
      %c0_39 = arith.constant 0 : index
      %30 = vector.load %arg4[%c0_37, %c0_38, %c0_39] : memref<2x6x32xf32, #tpu.memory_space<vmem>>, vector<2x6x32xf32>
      %31 = vector.shape_cast %30 : vector<2x6x32xf32> to vector<12x32xf32>
      %c0_40 = arith.constant 0 : index
      %c0_41 = arith.constant 0 : index
      %32 = vector.load %arg6[%c0_40, %c0_41] : memref<32x32xf32, #tpu.memory_space<vmem>>, vector<32x32xf32>
      %cst_42 = arith.constant dense<0.000000e+00> : vector<12x32xf32>
      %33 = tpu.matmul %31, %32, %cst_42 {dimension_numbers = #tpu.dot_dimension_numbers<[1], [0], [0], [1], [0, 0, 1, 1], [], []>} : vector<12x32xf32>, vector<32x32xf32>, vector<12x32xf32> -> vector<12x32xf32>
      %34 = vector.shape_cast %33 : vector<12x32xf32> to vector<2x6x32xf32>
      %c0_43 = arith.constant 0 : index
      %c0_44 = arith.constant 0 : index
      %c0_45 = arith.constant 0 : index
      %35 = vector.load %arg16[%c0_43, %c0_44, %c0_45] : memref<2x6x32xf32, #tpu.memory_space<vmem>>, vector<2x6x32xf32>
      tpu.vector_store %arg16[%c0_43, %c0_44, %c0_45], %34 {strides = array<i32>} : memref<2x6x32xf32, #tpu.memory_space<vmem>>, vector<2x6x32xf32>,
      %cst_46 = arith.constant 0.000000e+00 : f32
      %36 = vector.broadcast %cst_46 : f32 to vector<4x32xf32>
      %c0_47 = arith.constant 0 : index
      %c0_48 = arith.constant 0 : index
      %37 = vector.load %arg17[%c0_47, %c0_48] : memref<4x32xf32, #tpu.memory_space<vmem>>, vector<4x32xf32>
      tpu.vector_store %arg17[%c0_47, %c0_48], %36 {strides = array<i32>} : memref<4x32xf32, #tpu.memory_space<vmem>>, vector<4x32xf32>,
      %cst_49 = arith.constant 0.000000e+00 : f32
      %38 = vector.broadcast %cst_49 : f32 to vector<4x32xf32>
      %c0_50 = arith.constant 0 : index
      %c0_51 = arith.constant 0 : index
      %39 = vector.load %arg18[%c0_50, %c0_51] : memref<4x32xf32, #tpu.memory_space<vmem>>, vector<4x32xf32>
      tpu.vector_store %arg18[%c0_50, %c0_51], %38 {strides = array<i32>} : memref<4x32xf32, #tpu.memory_space<vmem>>, vector<4x32xf32>,
    } else {
    }
    %c0 = arith.constant 0 : index
    %c0_1 = arith.constant 0 : index
    %c0_2 = arith.constant 0 : index
    %c0_3 = arith.constant 0 : index
    %3 = vector.load %arg2[%c0, %c0_1, %c0_2, %c0_3] : memref<4x2x2x32xf32, #tpu.memory_space<vmem>>, vector<4x2x2x32xf32>
    %4 = vector.shape_cast %3 : vector<4x2x2x32xf32> to vector<16x32xf32>
    %c0_4 = arith.constant 0 : index
    %c0_5 = arith.constant 0 : index
    %5 = vector.load %arg8[%c0_4, %c0_5] : memref<32x288xf32, #tpu.memory_space<vmem>>, vector<32x288xf32>
    %cst = arith.constant dense<0.000000e+00> : vector<16x288xf32>
    %6 = tpu.matmul %4, %5, %cst {dimension_numbers = #tpu.dot_dimension_numbers<[1], [0], [0], [1], [0, 0, 1, 1], [], []>} : vector<16x32xf32>, vector<32x288xf32>, vector<16x288xf32> -> vector<16x288xf32>
    %c0_6 = arith.constant 0 : index
    %c0_7 = arith.constant 0 : index
    %7 = vector.load %arg11[%c0_6, %c0_7] : memref<1x288xf32, #tpu.memory_space<vmem>>, vector<1x288xf32>
    %8 = vector.broadcast %7 : vector<1x288xf32> to vector<16x288xf32>
    %9 = arith.addf %6, %8 : vector<16x288xf32>
    %10 = vector.shape_cast %9 : vector<16x288xf32> to vector<4x4x288xf32>
    %c0_8 = arith.constant 0 : index
    %c0_9 = arith.constant 0 : index
    %c0_10 = arith.constant 0 : index
    %11 = vector.load %arg15[%c0_8, %c0_9, %c0_10] : memref<4x4x288xf32, #tpu.memory_space<vmem>>, vector<4x4x288xf32>
    tpu.vector_store %arg15[%c0_8, %c0_9, %c0_10], %10 {strides = array<i32>} : memref<4x4x288xf32, #tpu.memory_space<vmem>>, vector<4x4x288xf32>,
    %c0_11 = arith.constant 0 : index
    %c0_12 = arith.constant 0 : index
    %c0_13 = arith.constant 0 : index
    %12 = vector.load %arg16[%c0_11, %c0_12, %c0_13] : memref<2x6x32xf32, #tpu.memory_space<vmem>>, vector<2x6x32xf32>
    %c0_14 = arith.constant 0 : index
    %c0_15 = arith.constant 0 : index
    %c0_16 = arith.constant 0 : index
    %13 = vector.load %arg4[%c0_14, %c0_15, %c0_16] : memref<2x6x32xf32, #tpu.memory_space<vmem>>, vector<2x6x32xf32>
    %c0_17 = arith.constant 0 : index
    %c0_18 = arith.constant 0 : index
    %14 = vector.load %arg5[%c0_17, %c0_18] : memref<2x6xf32, #tpu.memory_space<vmem>>, vector<2x6xf32>
    %15 = vector.shape_cast %14 : vector<2x6xf32> to vector<1x2x6xf32>
    %c0_19 = arith.constant 0 : index
    %c0_20 = arith.constant 0 : index
    %16 = vector.load %arg7[%c0_19, %c0_20] : memref<1x32xf32, #tpu.memory_space<vmem>>, vector<1x32xf32>
    %17 = vector.shape_cast %16 : vector<1x32xf32> to vector<1x1x1x32xf32>
    %c0_21 = arith.constant 0 : index
    %c0_22 = arith.constant 0 : index
    %18 = vector.load %arg9[%c0_21, %c0_22] : memref<32x288xf32, #tpu.memory_space<vmem>>, vector<32x288xf32>
    %c0_23 = arith.constant 0 : index
    %c0_24 = arith.constant 0 : index
    %19 = vector.load %arg10[%c0_23, %c0_24] : memref<32x256xf32, #tpu.memory_space<vmem>>, vector<32x256xf32>
    %c0_25 = arith.constant 0 : index
    %c0_26 = arith.constant 0 : index
    %20 = vector.load %arg17[%c0_25, %c0_26] : memref<4x32xf32, #tpu.memory_space<vmem>>, vector<4x32xf32>
    %c0_27 = arith.constant 0 : index
    %c0_28 = arith.constant 0 : index
    %21 = vector.load %arg18[%c0_27, %c0_28] : memref<4x32xf32, #tpu.memory_space<vmem>>, vector<4x32xf32>
    %c0_i32_29 = arith.constant 0 : i32
    %c4_i32 = arith.constant 4 : i32
    %22 = arith.addi %c0_i32_29, %c4_i32 : i32
    %c1_i32 = arith.constant 1 : i32
    %23:2 = scf.for %arg19 = %c0_i32_29 to %22 step %c1_i32 iter_args(%arg20 = %20, %arg21 = %21) -> (vector<4x32xf32>, vector<4x32xf32>)  : i32 {
      %30 = arith.index_cast %arg19 : i32 to index
      %c0_37 = arith.constant 0 : index
      %c0_38 = arith.constant 0 : index
      %31 = vector.load %arg15[%30, %c0_37, %c0_38] : memref<4x4x288xf32, #tpu.memory_space<vmem>>, vector<1x4x288xf32>
      %32 = vector.shape_cast %31 : vector<1x4x288xf32> to vector<4x288xf32>
      %33 = arith.index_cast %arg19 : i32 to index
      %c0_39 = arith.constant 0 : index
      %c0_40 = arith.constant 0 : index
      %c0_41 = arith.constant 0 : index
      %34 = vector.load %arg3[%33, %c0_39, %c0_40, %c0_41] : memref<4x2x2x1xf32, #tpu.memory_space<vmem>>, vector<1x2x2x1xf32>
      %35 = vector.shape_cast %34 : vector<1x2x2x1xf32> to vector<2x2x1xf32>
      %36 = vector.shape_cast %35 : vector<2x2x1xf32> to vector<4x1xf32>
      %cst_42 = arith.constant dense<0.000000e+00> : vector<4x288xf32>
      %37 = tpu.matmul %arg20, %18, %cst_42 {dimension_numbers = #tpu.dot_dimension_numbers<[1], [0], [0], [1], [0, 0, 1, 1], [], []>} : vector<4x32xf32>, vector<32x288xf32>, vector<4x288xf32> -> vector<4x288xf32>
      %38 = vector.extract_strided_slice %32 {offsets = [0, 256], sizes = [4, 32], strides = [1, 1]} : vector<4x288xf32> to vector<4x32xf32>
      %39 = vector.extract_strided_slice %37 {offsets = [0, 256], sizes = [4, 32], strides = [1, 1]} : vector<4x288xf32> to vector<4x32xf32>
      %40 = arith.addf %38, %39 : vector<4x32xf32>
      %41 = vector.shape_cast %40 : vector<4x32xf32> to vector<2x2x1x32xf32>
      %42 = vector.shape_cast %12 : vector<2x6x32xf32> to vector<1x2x6x32xf32>
      %43 = vector.broadcast %42 : vector<1x2x6x32xf32> to vector<2x2x6x32xf32>
      %44 = vector.broadcast %41 : vector<2x2x1x32xf32> to vector<2x2x6x32xf32>
      %45 = arith.addf %43, %44 : vector<2x2x6x32xf32>
      %46 = math.tanh %45 : vector<2x2x6x32xf32>
      %47 = vector.broadcast %17 : vector<1x1x1x32xf32> to vector<2x2x6x32xf32>
      %48 = arith.mulf %46, %47 : vector<2x2x6x32xf32>
      %cst_43 = arith.constant dense<0.000000e+00> : vector<2x2x6xf32>
      %49 = vector.multi_reduction <add>, %48, %cst_43 [3] : vector<2x2x6x32xf32> to vector<2x2x6xf32>
      %cst_44 = arith.constant dense<0xFF800000> : vector<2x2xf32>
      %50 = vector.multi_reduction <maximumf>, %49, %cst_44 [2] : vector<2x2x6xf32> to vector<2x2xf32>
      %51 = vector.shape_cast %50 : vector<2x2xf32> to vector<2x2x1xf32>
      %52 = vector.broadcast %51 : vector<2x2x1xf32> to vector<2x2x6xf32>
      %53 = arith.subf %49, %52 : vector<2x2x6xf32>
      %54 = math.exp %53 : vector<2x2x6xf32>
      %55 = vector.broadcast %15 : vector<1x2x6xf32> to vector<2x2x6xf32>
      %56 = arith.mulf %54, %55 : vector<2x2x6xf32>
      "tpu.trace_start"() <{level = 10 : i32, message = "dbt,btq->dbq"}> : () -> ()
      %cst_45 = arith.constant dense<0.000000e+00> : vector<2x32x2xf32>
      %57 = tpu.matmul %13, %56, %cst_45 {dimension_numbers = #tpu.dot_dimension_numbers<[1], [2], [2], [0], [0, 0, 0, 2, 1, 0], [0], [1]>} : vector<2x6x32xf32>, vector<2x2x6xf32>, vector<2x32x2xf32> -> vector<2x32x2xf32>
      %58 = tpu.transpose %57, [2, 0, 1] : vector<2x32x2xf32> -> vector<2x2x32xf32>
      "tpu.trace_stop"() : () -> ()
      %cst_46 = arith.constant dense<0.000000e+00> : vector<2x2xf32>
      %59 = vector.multi_reduction <add>, %56, %cst_46 [2] : vector<2x2x6xf32> to vector<2x2xf32>
      %60 = vector.shape_cast %59 : vector<2x2xf32> to vector<2x2x1xf32>
      %cst_47 = arith.constant 9.99999997E-7 : f32
      %61 = vector.broadcast %cst_47 : f32 to vector<2x2x1xf32>
      %62 = arith.addf %60, %61 : vector<2x2x1xf32>
      %63 = tpu.reciprocal %62 : vector<2x2x1xf32> -> vector<2x2x1xf32>
      %64 = vector.broadcast %63 : vector<2x2x1xf32> to vector<2x2x32xf32>
      %65 = arith.mulf %58, %64 : vector<2x2x32xf32>
      %66 = vector.shape_cast %65 : vector<2x2x32xf32> to vector<4x32xf32>
      %cst_48 = arith.constant dense<0.000000e+00> : vector<4x256xf32>
      %67 = tpu.matmul %66, %19, %cst_48 {dimension_numbers = #tpu.dot_dimension_numbers<[1], [0], [0], [1], [0, 0, 1, 1], [], []>} : vector<4x32xf32>, vector<32x256xf32>, vector<4x256xf32> -> vector<4x256xf32>
      %68 = vector.extract_strided_slice %32 {offsets = [0, 0], sizes = [2, 128], strides = [1, 1]} : vector<4x288xf32> to vector<2x128xf32>
      %69 = vector.extract_strided_slice %37 {offsets = [0, 0], sizes = [2, 128], strides = [1, 1]} : vector<4x288xf32> to vector<2x128xf32>
      %70 = arith.addf %68, %69 : vector<2x128xf32>
      %71 = vector.extract_strided_slice %67 {offsets = [0, 0], sizes = [2, 128], strides = [1, 1]} : vector<4x256xf32> to vector<2x128xf32>
      %72 = arith.addf %70, %71 : vector<2x128xf32>
      %73 = vector.extract_strided_slice %32 {offsets = [2, 128], sizes = [2, 128], strides = [1, 1]} : vector<4x288xf32> to vector<2x128xf32>
      %74 = vector.extract_strided_slice %37 {offsets = [2, 128], sizes = [2, 128], strides = [1, 1]} : vector<4x288xf32> to vector<2x128xf32>
      %75 = arith.addf %73, %74 : vector<2x128xf32>
      %76 = vector.extract_strided_slice %67 {offsets = [2, 128], sizes = [2, 128], strides = [1, 1]} : vector<4x256xf32> to vector<2x128xf32>
      %77 = arith.addf %75, %76 : vector<2x128xf32>
      %78 = tpu.concatenate %72, %77 in 0 : vector<2x128xf32>, vector<2x128xf32> -> vector<4x128xf32>
      %79 = vector.extract_strided_slice %78 {offsets = [0, 0], sizes = [4, 96], strides = [1, 1]} : vector<4x128xf32> to vector<4x96xf32>
      %80 = arith.negf %79 : vector<4x96xf32>
      %81 = math.exp %80 : vector<4x96xf32>
      %cst_49 = arith.constant 1.000000e+00 : f32
      %82 = vector.broadcast %cst_49 : f32 to vector<4x96xf32>
      %83 = arith.addf %82, %81 : vector<4x96xf32>
      %84 = arith.divf %82, %83 : vector<4x96xf32>
      %85 = vector.extract_strided_slice %84 {offsets = [0, 0], sizes = [4, 32], strides = [1, 1]} : vector<4x96xf32> to vector<4x32xf32>
      %86 = vector.extract_strided_slice %84 {offsets = [0, 32], sizes = [4, 32], strides = [1, 1]} : vector<4x96xf32> to vector<4x32xf32>
      %87 = vector.extract_strided_slice %84 {offsets = [0, 64], sizes = [4, 32], strides = [1, 1]} : vector<4x96xf32> to vector<4x32xf32>
      %88 = vector.extract_strided_slice %78 {offsets = [0, 96], sizes = [4, 32], strides = [1, 1]} : vector<4x128xf32> to vector<4x32xf32>
      %89 = math.tanh %88 : vector<4x32xf32>
      %90 = arith.mulf %86, %arg21 : vector<4x32xf32>
      %91 = arith.mulf %85, %89 : vector<4x32xf32>
      %92 = arith.addf %90, %91 : vector<4x32xf32>
      %93 = math.tanh %92 : vector<4x32xf32>
      %94 = arith.mulf %87, %93 : vector<4x32xf32>
      %cst_50 = arith.constant 0.000000e+00 : f32
      %95 = vector.broadcast %cst_50 : f32 to vector<4x1xf32>
      %96 = arith.cmpf ogt, %36, %95 : vector<4x1xf32>
      %97 = vector.shape_cast %96 : vector<4x1xi1> to vector<4x1xi1>
      %98 = vector.broadcast %97 : vector<4x1xi1> to vector<4x32xi1>
      %99 = arith.select %98, %94, %arg20 : vector<4x32xi1>, vector<4x32xf32>
      %100 = vector.shape_cast %96 : vector<4x1xi1> to vector<4x1xi1>
      %101 = vector.broadcast %100 : vector<4x1xi1> to vector<4x32xi1>
      %102 = arith.select %101, %92, %arg21 : vector<4x32xi1>, vector<4x32xf32>
      %103 = vector.broadcast %36 : vector<4x1xf32> to vector<4x32xf32>
      %104 = arith.mulf %99, %103 : vector<4x32xf32>
      %105 = vector.extract_strided_slice %104 {offsets = [0, 0], sizes = [2, 32], strides = [1, 1]} : vector<4x32xf32> to vector<2x32xf32>
      %106 = arith.index_cast %arg19 : i32 to index
      %c0_51 = arith.constant 0 : index
      %c0_52 = arith.constant 0 : index
      %107 = vector.load %arg12[%106, %c0_51, %c0_52] : memref<4x2x32xf32, #tpu.memory_space<vmem>>, vector<1x2x32xf32>
      %108 = vector.shape_cast %107 : vector<1x2x32xf32> to vector<2x32xf32>
      %109 = vector.shape_cast %105 : vector<2x32xf32> to vector<1x2x32xf32>
      tpu.vector_store %arg12[%106, %c0_51, %c0_52], %109 {strides = array<i32>} : memref<4x2x32xf32, #tpu.memory_space<vmem>>, vector<1x2x32xf32>,
      %110 = vector.extract_strided_slice %104 {offsets = [2, 0], sizes = [2, 32], strides = [1, 1]} : vector<4x32xf32> to vector<2x32xf32>
      %c3_i32 = arith.constant 3 : i32
      %111 = arith.subi %c3_i32, %arg19 : i32
      %112 = arith.index_cast %111 : i32 to index
      %c0_53 = arith.constant 0 : index
      %c0_54 = arith.constant 0 : index
      %113 = vector.load %arg13[%112, %c0_53, %c0_54] : memref<4x2x32xf32, #tpu.memory_space<vmem>>, vector<1x2x32xf32>
      %114 = vector.shape_cast %113 : vector<1x2x32xf32> to vector<2x32xf32>
      %115 = vector.shape_cast %110 : vector<2x32xf32> to vector<1x2x32xf32>
      tpu.vector_store %arg13[%112, %c0_53, %c0_54], %115 {strides = array<i32>} : memref<4x2x32xf32, #tpu.memory_space<vmem>>, vector<1x2x32xf32>,
      scf.yield %99, %102 : vector<4x32xf32>, vector<4x32xf32>
    }
    %c4_i32_30 = arith.constant 4 : i32
    %c0_31 = arith.constant 0 : index
    %c0_32 = arith.constant 0 : index
    %24 = vector.load %arg17[%c0_31, %c0_32] : memref<4x32xf32, #tpu.memory_space<vmem>>, vector<4x32xf32>
    tpu.vector_store %arg17[%c0_31, %c0_32], %23#0 {strides = array<i32>} : memref<4x32xf32, #tpu.memory_space<vmem>>, vector<4x32xf32>,
    %c0_33 = arith.constant 0 : index
    %c0_34 = arith.constant 0 : index
    %25 = vector.load %arg18[%c0_33, %c0_34] : memref<4x32xf32, #tpu.memory_space<vmem>>, vector<4x32xf32>
    tpu.vector_store %arg18[%c0_33, %c0_34], %23#1 {strides = array<i32>} : memref<4x32xf32, #tpu.memory_space<vmem>>, vector<4x32xf32>,
    %26 = vector.extract_strided_slice %23#0 {offsets = [0, 0], sizes = [2, 32], strides = [1, 1]} : vector<4x32xf32> to vector<2x32xf32>
    %27 = vector.extract_strided_slice %23#0 {offsets = [2, 0], sizes = [2, 32], strides = [1, 1]} : vector<4x32xf32> to vector<2x32xf32>
    %28 = tpu.concatenate %26, %27 in 1 : vector<2x32xf32>, vector<2x32xf32> -> vector<2x64xf32>
    %c0_35 = arith.constant 0 : index
    %c0_36 = arith.constant 0 : index
    %29 = vector.load %arg14[%c0_35, %c0_36] : memref<2x64xf32, #tpu.memory_space<vmem>>, vector<2x64xf32>
    tpu.vector_store %arg14[%c0_35, %c0_36], %28 {strides = array<i32>} : memref<2x64xf32, #tpu.memory_space<vmem>>, vector<2x64xf32>,
    return
  }
  func.func @transform_0(%arg0: i32, %arg1: i32) -> (i32, i32, i32, i32) {
    %c0_i32 = arith.constant 0 : i32
    %c0_i32_0 = arith.constant 0 : i32
    %c0_i32_1 = arith.constant 0 : i32
    return %arg1, %c0_i32, %arg0, %c0_i32_0 : i32, i32, i32, i32
  }
  func.func @transform_1(%arg0: i32, %arg1: i32) -> (i32, i32, i32, i32) {
    %c0_i32 = arith.constant 0 : i32
    %c0_i32_0 = arith.constant 0 : i32
    %c0_i32_1 = arith.constant 0 : i32
    return %arg1, %c0_i32, %arg0, %c0_i32_0 : i32, i32, i32, i32
  }
  func.func @transform_2(%arg0: i32, %arg1: i32) -> (i32, i32, i32) {
    %c0_i32 = arith.constant 0 : i32
    %c0_i32_0 = arith.constant 0 : i32
    %c0_i32_1 = arith.constant 0 : i32
    return %arg0, %c0_i32, %c0_i32_0 : i32, i32, i32
  }
  func.func @transform_3(%arg0: i32, %arg1: i32) -> (i32, i32) {
    %c0_i32 = arith.constant 0 : i32
    %c0_i32_0 = arith.constant 0 : i32
    return %arg0, %c0_i32 : i32, i32
  }
  func.func @transform_4(%arg0: i32, %arg1: i32) -> (i32, i32) {
    %c0_i32 = arith.constant 0 : i32
    %c0_i32_0 = arith.constant 0 : i32
    %c0_i32_1 = arith.constant 0 : i32
    return %c0_i32, %c0_i32_0 : i32, i32
  }
  func.func @transform_5(%arg0: i32, %arg1: i32) -> (i32, i32) {
    %c0_i32 = arith.constant 0 : i32
    %c0_i32_0 = arith.constant 0 : i32
    %c0_i32_1 = arith.constant 0 : i32
    return %c0_i32, %c0_i32_0 : i32, i32
  }
  func.func @transform_6(%arg0: i32, %arg1: i32) -> (i32, i32) {
    %c0_i32 = arith.constant 0 : i32
    %c0_i32_0 = arith.constant 0 : i32
    %c0_i32_1 = arith.constant 0 : i32
    return %c0_i32, %c0_i32_0 : i32, i32
  }
  func.func @transform_7(%arg0: i32, %arg1: i32) -> (i32, i32) {
    %c0_i32 = arith.constant 0 : i32
    %c0_i32_0 = arith.constant 0 : i32
    %c0_i32_1 = arith.constant 0 : i32
    return %c0_i32, %c0_i32_0 : i32, i32
  }
  func.func @transform_8(%arg0: i32, %arg1: i32) -> (i32, i32) {
    %c0_i32 = arith.constant 0 : i32
    %c0_i32_0 = arith.constant 0 : i32
    %c0_i32_1 = arith.constant 0 : i32
    return %c0_i32, %c0_i32_0 : i32, i32
  }
  func.func @transform_9(%arg0: i32, %arg1: i32) -> (i32, i32) {
    %c0_i32 = arith.constant 0 : i32
    %c0_i32_0 = arith.constant 0 : i32
    %c0_i32_1 = arith.constant 0 : i32
    return %c0_i32, %c0_i32_0 : i32, i32
  }
  func.func @transform_10(%arg0: i32, %arg1: i32) -> (i32, i32, i32) {
    %c0_i32 = arith.constant 0 : i32
    %c0_i32_0 = arith.constant 0 : i32
    return %arg1, %arg0, %c0_i32 : i32, i32, i32
  }
  func.func @transform_11(%arg0: i32, %arg1: i32) -> (i32, i32, i32) {
    %c1_i32 = arith.constant 1 : i32
    %0 = arith.subi %c1_i32, %arg1 : i32
    %c0_i32 = arith.constant 0 : i32
    %c0_i32_0 = arith.constant 0 : i32
    return %0, %arg0, %c0_i32 : i32, i32, i32
  }
  func.func @transform_12(%arg0: i32, %arg1: i32) -> (i32, i32) {
    %c0_i32 = arith.constant 0 : i32
    %c0_i32_0 = arith.constant 0 : i32
    return %arg0, %c0_i32 : i32, i32
  }
}

</mosaic_0001>

<bundles_post_ra>
// kernel: _lambda_.1
= control target key start
LH: loop header
LB: loop body
LE: loop exit
PB: predicated region body
PF: predicated region fallthrough
CT: control target
= control target key end

     0   :  { %18 = vsyncpa [#allocation7], 0  ;;  %s3037_s21 = smov 0   ;;  %s3039_s22 = smov 0   ;;  %s3488_s0 = inlined_call_operand.vmem [shape: f32[8,2,2,32], index: 0, kind: input, shape index: {}]   ;;  %s3489_s1 = inlined_call_operand.vmem [shape: f32[8,2,2,1], index: 1, kind: input, shape index: {}]   ;;  %s3490_s2 = inlined_call_operand.vmem [shape: f32[2,6,32], index: 2, kind: input, shape index: {}]   ;;  %s3491_s3 = inlined_call_operand.vmem [shape: f32[2,6], index: 3, kind: input, shape index: {}]   ;;  %s3492_s4 = inlined_call_operand.vmem [shape: f32[32,32], index: 4, kind: input, shape index: {}]   ;;  %s3493_s5 = inlined_call_operand.vmem [shape: f32[1,32], index: 5, kind: input, shape index: {}]   ;;  %s3494_s6 = inlined_call_operand.vmem [shape: f32[32,288], index: 6, kind: input, shape index: {}]   ;;  %s3495_s7 = inlined_call_operand.vmem [shape: f32[32,288], index: 7, kind: input, shape index: {}]   ;;  %s3496_s8 = inlined_call_operand.vmem [shape: f32[32,256], index: 8, kind: input, shape index: {}]   ;;  %s3497_s9 = inlined_call_operand.vmem [shape: f32[1,288], index: 9, kind: input, shape index: {}]   ;;  %s3498_s10 = inlined_call_operand.vmem [shape: f32[8,2,32], index: 10, kind: output, shape index: {0}]   ;;  %s3499_s11 = inlined_call_operand.vmem [shape: f32[8,2,32], index: 11, kind: output, shape index: {1}]   ;;  %s3500_s12 = inlined_call_operand.hbm [shape: f32[2,64], index: 12, kind: output, shape index: {2}]  }
   0x1   :  { %s3041_s23 = smov 0  }
   0x2 LB: > { %3502 = sst [smem:[#allocation9_spill]] %s2938_s22  ;;  %s33_s25 = sadd.s32 1, %s2938_s22  ;;  %s2942_s23 = sphi %s3041_s23, %s24_s23   ;;  %s2938_s22 = sphi %s3039_s22, %s3511_s22   ;;  %s2934_s21 = sphi %s3037_s21, %s3510_s21  }
   0x3   : > { %p34_p0 = scmp.ge.s32.totalorder %s33_s25, 2  ;;  %p2605_p1 = scmp.ge.s32.totalorder %s2942_s23, 1 }
   0x4   : > { %p430_p2 = scmp.lt.s32.totalorder %s2942_s23, 3 }
   0x5   : > { %s3513_s25 = smov (%p34_p0, %s33_s25), 0 }
   0x6   : > { %3503 = sst [smem:[#allocation10_spill]] %s3513_s25  ;;  %p431_p3 = pnand %p2605_p1, %p430_p2 }
   0x7   : > { %s2606_s26 = sshll.u32 (!%p431_p3), %s2934_s21, 2  ;;  %s545_s27 = ssub.s32 (!%p431_p3), 1, %s2934_s21 }
   0x8   : > { %434 = sbr.rel (%p431_p3) target bundleno = 2675 (0xa73), region = 60  ;;  %p507_p4 = scmp.lt.s32.totalorder (!%p431_p3), %s2606_s26, 7 }
   0x9   : > { %s2614_s28 = sshll.u32 (!%p431_p3), %s545_s27, 2  ;;  %p2616_p6 = scmp.ne.s32.totalorder (!%p431_p3), %s2934_s21, 0 }
   0xa   : > { %p547_p5 = scmp.lt.s32.totalorder (!%p431_p3), %s2614_s28, 7 }
   0xf   : > { %s3515_s26 = smov (!%p507_p4, %s2606_s26), 7  ;;  %s3517_s28 = smov (!%p547_p5, %s2614_s28), 7 }
  0x10   : > { %s2647_s29 = sshll.u32 %s3515_s26, 2  ;;  %s2613_s30 = sshll.u32 %s3515_s26, 1  ;;  %v596_v0 = vld [vmem:[%s3492_s4] sm:$0xff] (!%p2616_p6)  ;;  %v597_v1 = vld [vmem:[%s3492_s4 + $0x8] sm:$0xff] (!%p2616_p6)  ;;  %v598_v2 = vld [vmem:[%s3492_s4 + $0x10] sm:$0xff] (!%p2616_p6)  ;;  %v568_v3 = vlaneseq (!%p2616_p6)  ;;  %vm625_vm0 = vcmask (!%p2616_p6), 261120  }
  0x11   : > { %s3059_s15 = scalar_lea.vmem %s3488_s0, %s2647_s29  ;;  %s3064_s18 = scalar_lea.vmem %s3489_s1, %s2647_s29  ;;  %v2726_v4 = vpack.c.bf16 (!%p2616_p6), %v597_v1, %v596_v0  ;;  %v599_v5 = vld [vmem:[%s3492_s4 + $0x18] sm:$0xff] (!%p2616_p6)  ;;  %v560_v6 = vld [vmem:[%s3490_s2] sm:$0x3f] (!%p2616_p6)  ;;  %v561_v7 = vld [vmem:[%s3490_s2 + $0x8] sm:$0x3f] (!%p2616_p6)  ;;  %vm769_vm1 = vcmask (!%p2616_p6), 257024  }
  0x12   : > { %s3069_s24 = scalar_lea.vmem %s3498_s10, %s2613_s30  ;;  %s2615_s27 = sshll.u32 %s3517_s28, 1  ;;  %v2956_v8 = vmov (!%p2616_p6), 1983009808   ;;  %v2730_v10 = vpack.c.bf16 (!%p2616_p6), %v599_v5, %v598_v2  ;;  %v569_v11 = vshrl.u32 (!%p2616_p6), %v568_v3, 7  ;;  %v564_v12 = vcombine.high (!%p2616_p6), %v560_v6, %v560_v6 }
  0x13   : > { %s3074_s26 = scalar_lea.vmem %s3499_s11, %s2615_s27  ;;  %559 = sbr.rel (%p2616_p6) target bundleno = 262 (0x106), region = 64  ;;  %v566_v9 = vunpack.c.l.s4 (!%p2616_p6), %v2956_v8  ;;  %2727 = vmatprep.subr.bf16.mxu0 (!%p2616_p6), %v2726_v4  ;;  %v580_v14 = vcombine.high (!%p2616_p6), %v561_v7, %v561_v7  ;;  %v2957_v29 = vmov (!%p2616_p6), 0.0   ;;  %vm766_vm2 = vcmask (!%p2616_p6), 259072  }
  0x14   : > { %2729 = vmatpush3.bf16.msra.mxu0 (!%p2616_p6), %v2726_v4  ;;  %770 = vst.msk [vmem:[#allocation4] sm:$0xf] (!%p2616_p6), %vm769_vm1, %v2957_v29  ;;  %771 = vst.msk [vmem:[#allocation5] sm:$0xf] (!%p2616_p6), %vm769_vm1, %v2957_v29 }
  0x15   : > { %v567_v13 = vunpack.c.0.s8 (!%p2616_p6), %v566_v9  ;;  %2731 = vmatprep.subr.bf16.mxu0 (!%p2616_p6), %v2730_v10 }
  0x17   : > { %v570_v15 = vsub.s32 (!%p2616_p6), %v567_v13, %v569_v11 }
  0x18   : > { %2733 = vmatpush3.bf16.msra.mxu0 (!%p2616_p6), %v2730_v10 }
  0x19   : > { %v571_v16 = vrot.slane (!%p2616_p6), %v560_v6, %v570_v15  ;;  %v578_v17 = vrot.slane (!%p2616_p6), %v564_v12, %v570_v15  ;;  %v587_v18 = vrot.slane (!%p2616_p6), %v561_v7, %v570_v15  ;;  %v594_v19 = vrot.slane (!%p2616_p6), %v580_v14, %v570_v15 }
  0x1b   : > { %v579_v20 = vcombine.high %v571_v16, %v571_v16  ;;  %v595_v21 = vcombine.high %v587_v18, %v587_v18  ;;  %v601_v22 = vcombine.low %v578_v17, %v587_v18 }
  0x1d   : > { %v600_v23 = vcombine.low %v571_v16, %v579_v20  ;;  %v615_v24 = vrot.slane %v601_v22, %v570_v15  ;;  %v617_v25 = vcombine.low %v595_v21, %v594_v19 }
  0x1f   : > { %v608_v26 = vrot.slane %v600_v23, %v570_v15  ;;  %v624_v27 = vrot.slane %v617_v25, %v570_v15 }
  0x21   : > { %v616_v28 = vcombine.low %v608_v26, %v615_v24 }
  0x23   : > { %2685 = vmatprep.mubr.msk.f32.mxu0 %vm625_vm0, %v616_v28 }
  0x24   : > { %2686 = vmatmul.mubr.msk.f32.vlgmr.msra.gmra.mrb[0].mxu0 %vm625_vm0, %v624_v27 }
  0xf7   : > { %v2687_v30 = vpop.f32.mrb[0].mxu0 }
  0xf8   : > { %v696_v31 = vpop.f32.mrb[1].mxu0  ;;  %v730_v32 = vrot.slane %v2687_v30, %v570_v15 }
  0xf9   : > { %v707_v33 = vcombine.high %v696_v31, %v696_v31  ;;  %v714_v34 = vrot.slane %v696_v31, %v570_v15 }
  0xfa   : > { %v731_v37 = vcombine.high %v730_v32, %v730_v32 }
  0xfb   : > { %v721_v35 = vrot.slane %v707_v33, %v570_v15  ;;  %v722_v36 = vcombine.high %v714_v34, %v714_v34 }
  0xfc   : > { %v762_v43 = vrot.slane %v731_v37, %v570_v15 }
  0xfd   : > { %v723_v38 = vcombine.high %v721_v35, %v721_v35  ;;  %v732_v39 = vcombine.low %v714_v34, %v722_v36  ;;  %v746_v41 = vrot.slane %v721_v35, %v570_v15 }
  0xff   : > { %v739_v40 = vrot.slane %v732_v39, %v570_v15  ;;  %v748_v42 = vcombine.low %v723_v38, %v730_v32 }
 0x101   : > { %v747_v44 = vcombine.low %v739_v40, %v746_v41  ;;  %v755_v45 = vrot.slane %v748_v42, %v570_v15 }
 0x103   : > { %v763_v46 = vcombine.low %v755_v45, %v762_v43  ;;  %767 = vst.msk [vmem:[#allocation3] sm:$0x3f] %vm766_vm2, %v747_v44 }
 0x105   : > { %768 = vst.msk [vmem:[#allocation3 + $0x8] sm:$0x3f] %vm766_vm2, %v763_v46 }
 0x106 PF: > { %v781_v47 = vld [vmem:[%s3494_s6 + $0x8] sm:$0xff]  ;;  %v784_v48 = vld [vmem:[%s3494_s6 + $0x20] sm:$0xff]  ;;  %v794_v50 = vlaneseq  ;;  %v783_v52 = vld [vmem:[%s3494_s6 + $0x18] sm:$0xff]  ;;  %v2958_v55 = vmov 0.0   ;;  %v2959_v56 = vmov 1983009808  }
 0x107   : > { %v780_v49 = vld [vmem:[%s3494_s6] sm:$0xff]  ;;  %v2734_v51 = vpack.c.bf16 %v784_v48, %v781_v47  ;;  %v782_v53 = vld [vmem:[%s3494_s6 + $0x10] sm:$0xff]  ;;  %v785_v54 = vld [vmem:[%s3494_s6 + $0x28] sm:$0xff]  ;;  %920 = vmatprep.mubr.f32.mxu0 %v2958_v55  ;;  %v820_v57 = vunpack.c.l.s4 %v2959_v56  ;;  %vm851_vm3 = vcmask 261120   ;;  %vm1027_vm4 = vcmask 257024   ;;  %s3296_s17 = smov 0  }
 0x108   : > { %v2736_v58 = vpack.c.bf16 %v783_v52, %v780_v49  ;;  %v2742_v59 = vpack.c.bf16 %v785_v54, %v782_v53  ;;  %v787_v60 = vld [vmem:[%s3494_s6 + $0x38] sm:$0xff]  ;;  %v790_v61 = vld [vmem:[%s3494_s6 + $0x50] sm:$0xff]  ;;  %v3122_v63 = vshrl.u32 %v794_v50, 7  ;;  %v789_v1 = vld [vmem:[%s3494_s6 + $0x48] sm:$0xff] }
 0x109   : > { %v786_v62 = vld [vmem:[%s3494_s6 + $0x30] sm:$0xff]  ;;  %2735 = vmatprep.subr.bf16.mxu0 %v2734_v51  ;;  %v2738_v0 = vpack.c.bf16 %v790_v61, %v787_v60  ;;  %v788_v2 = vld [vmem:[%s3494_s6 + $0x40] sm:$0xff]  ;;  %v791_v3 = vld [vmem:[%s3494_s6 + $0x58] sm:$0xff]  ;;  %v821_v4 = vunpack.c.0.s8 %v820_v57 }
 0x10a   : > { %2737 = vmatpush1.bf16.msra.mxu0 %v2736_v58  ;;  %2743 = vmatprep.subr.bf16.mxu1 %v2742_v59  ;;  %v2740_v5 = vpack.c.bf16 %v789_v1, %v786_v62  ;;  %v2746_v6 = vpack.c.bf16 %v791_v3, %v788_v2  ;;  %v772_v7 = vld [vmem:[%s3059_s15] sm:$0x3]  ;;  %v773_v8 = vld [vmem:[%s3059_s15 + $0x2] sm:$0x3]  ;;  %v774_v9 = vld [vmem:[%s3059_s15 + $0x4] sm:$0x3] }
 0x10b   : > { %2739 = vmatprep.subr.bf16.mxu0 %v2738_v0  ;;  %2745 = vmatpush3.bf16.msra.mxu1 %v2742_v59  ;;  %v775_v10 = vld [vmem:[%s3059_s15 + $0x6] sm:$0x3]  ;;  %v817_v11 = vcombine.low %v772_v7, %v773_v8  ;;  %v3138_v12 = vsub.s32 %v821_v4, %v3122_v63  ;;  %v776_v13 = vld [vmem:[%s3059_s15 + $0x8] sm:$0x3]  ;;  %v777_v14 = vld [vmem:[%s3059_s15 + $0xa] sm:$0x3] }
 0x10c   : > { %2747 = vmatprep.subr.bf16.mxu1 %v2746_v6  ;;  %v818_v15 = vcombine.low %v774_v9, %v775_v10  ;;  %v778_v16 = vld [vmem:[%s3059_s15 + $0xc] sm:$0x3]  ;;  %v779_v17 = vld [vmem:[%s3059_s15 + $0xe] sm:$0x3]  ;;  %v834_v18 = vcombine.low %v776_v13, %v777_v14  ;;  %v3152_v26 = vld [vmem:[#allocation3] sm:$0x3f] }
 0x10d   : > { %v825_v19 = vrot.slane %v817_v11, %v3138_v12  ;;  %v835_v20 = vcombine.low %v778_v16, %v779_v17  ;;  %v3154_v27 = vld [vmem:[#allocation3 + $0x8] sm:$0x3f]  ;;  %v3159_v28 = vld [vmem:[%s3490_s2] sm:$0x3f]  ;;  %v3164_v29 = vld [vmem:[%s3490_s2 + $0x8] sm:$0x3f] }
 0x10e   : > { %2741 = vmatpush1.bf16.msra.mxu0 %v2740_v5  ;;  %v832_v21 = vrot.slane %v818_v15, %v3138_v12  ;;  %v842_v22 = vrot.slane %v834_v18, %v3138_v12  ;;  %v3169_v30 = vld [vmem:[%s3491_s3] sm:$0x3]  ;;  %v3184_v33 = vld [vmem:[%s3495_s7 + $0x8] sm:$0xff]  ;;  %v3189_v34 = vld [vmem:[%s3495_s7 + $0x10] sm:$0xff]  ;;  %v3283_v57 = vsub.s32 1, %v3122_v63  ;;  %v804_v58 = vsub.s32 2, %v3122_v63 }
 0x10f   : > { %2749 = vmatpush3.bf16.msra.mxu1 %v2746_v6  ;;  %v849_v23 = vrot.slane %v835_v20, %v3138_v12  ;;  %v3174_v31 = vld [vmem:[%s3493_s5] ss:$0 sm:$0xff]  ;;  %v3194_v35 = vld [vmem:[%s3495_s7 + $0x18] sm:$0xff]  ;;  %v3204_v37 = vld [vmem:[%s3495_s7 + $0x28] sm:$0xff] }
 0x110   : > { %v833_v24 = vcombine.low %v825_v19, %v832_v21  ;;  %v3179_v32 = vld [vmem:[%s3495_s7] sm:$0xff]  ;;  %v3209_v38 = vld [vmem:[%s3495_s7 + $0x30] sm:$0xff]  ;;  %v3214_v39 = vld [vmem:[%s3495_s7 + $0x38] sm:$0xff] }
 0x111   : > { %v850_v25 = vcombine.low %v842_v22, %v849_v23  ;;  %v3199_v36 = vld [vmem:[%s3495_s7 + $0x20] sm:$0xff]  ;;  %v3224_v41 = vld [vmem:[%s3495_s7 + $0x48] sm:$0xff]  ;;  %v3229_v42 = vld [vmem:[%s3495_s7 + $0x50] sm:$0xff] }
 0x112   : > { %2619 = vmatmul.mubr.msk.f32.vlgmr.msra.gmra.mrb[0].mxu0 %vm851_vm3, %v833_v24  ;;  %2696 = vmatprep.mubr.msk.f32.mxu1 %vm851_vm3, %v833_v24  ;;  %v3219_v40 = vld [vmem:[%s3495_s7 + $0x40] sm:$0xff]  ;;  %v3234_v43 = vld [vmem:[%s3495_s7 + $0x58] sm:$0xff]  ;;  %v3244_v45 = vld [vmem:[%s3496_s8 + $0x8] sm:$0xff] }
 0x113   : > { %926 = vmatprep.mubr.f32.mxu0 %v2958_v55  ;;  %2697 = vmatmul.mubr.msk.f32.vlgmr.msra.gmra.mrb[0].mxu1 %vm851_vm3, %v850_v25  ;;  %v3239_v44 = vld [vmem:[%s3496_s8] sm:$0xff]  ;;  %v3249_v46 = vld [vmem:[%s3496_s8 + $0x10] sm:$0xff]  ;;  %v3254_v47 = vld [vmem:[%s3496_s8 + $0x18] sm:$0xff]  ;;  %v3277_v55 = vsub.s32 0, %v3122_v63 }
 0x114   : > { %v3259_v48 = vld [vmem:[%s3496_s8 + $0x20] sm:$0xff]  ;;  %v3264_v49 = vld [vmem:[%s3496_s8 + $0x28] sm:$0xff]  ;;  %v3269_v51 = vld [vmem:[%s3496_s8 + $0x30] sm:$0xff] }
 0x115   : > { %v3274_v52 = vld [vmem:[%s3496_s8 + $0x38] sm:$0xff]  ;;  %v1061_v53 = vld [vmem:[#allocation4] sm:$0xf]   ;;  %v1062_v54 = vld [vmem:[#allocation5] sm:$0xf]  }
 0x116   : > { %2620 = vmatmul.mubr.msk.f32.gmra.mrb[2].mxu0 %vm851_vm3, %v850_v25  ;;  %v792_v56 = vld [vmem:[%s3497_s9] sm:$0x7] }
 0x117   : > { %v797_v59 = vrot.slane %v792_v56, %v3277_v55  ;;  %v801_v60 = vrot.slane %v792_v56, %v3283_v57  ;;  %v805_v61 = vrot.slane %v792_v56, %v804_v58 }
 0x1e5   : > { %v922_v62 = vpop.f32.mrb[0].mxu0 }
 0x1e6   : > { %v923_v0 = vadd.f32 %v922_v62, %v797_v59  ;;  %v924_v1 = vpop.f32.mrb[1].mxu0  ;;  %v2698_v2 = vpop.f32.mrb[0].mxu1 }
 0x1e7   : > { %v925_v3 = vadd.f32 %v924_v1, %v801_v60  ;;  %v1005_v4 = vadd.f32 %v2698_v2, %v805_v61  ;;  %v999_v5 = vpop.f32.mrb[1].mxu1 }
 0x1e8   : > { %v1000_v6 = vadd.f32 %v999_v5, %v805_v61 }
 0x1e9   : > { %v1014_v7 = vcombine.low %v923_v0, %v925_v3  ;;  %v1015_v8 = vcombine.high %v923_v0, %v925_v3  ;;  %v1019_v9 = vcombine.high %v1005_v4, %v1005_v4  ;;  %1032 = vst.msk [vmem:[#allocation2 + $0x20] sm:$0xf] %vm1027_vm4, %v1005_v4  ;;  %v928_v10 = vpop.f32.mrb[2].mxu0 }
 0x1ea   : > { %v929_v11 = vadd.f32 %v928_v10, %v797_v59  ;;  %v1016_v13 = vcombine.high %v1000_v6, %v1000_v6  ;;  %1028 = vst.msk [vmem:[#allocation2 + $0x8] sm:$0xf] %vm1027_vm4, %v1000_v6  ;;  %v930_v14 = vpop.f32.mrb[3].mxu0 }
 0x1eb   : > { %1026 = vst [vmem:[#allocation2] sm:$0xff] %v1014_v7  ;;  %1029 = vst [vmem:[#allocation2 + $0xc] sm:$0xff] %v1015_v8  ;;  %v931_v15 = vadd.f32 %v930_v14, %v801_v60 }
 0x1ec   : > { %1034 = vst.msk [vmem:[#allocation2 + $0x2c] sm:$0xf] %vm1027_vm4, %v1019_v9  ;;  %1030 = vst.msk [vmem:[#allocation2 + $0x14] sm:$0xf] %vm1027_vm4, %v1016_v13 }
 0x1ed   : > { %v1017_v16 = vcombine.low %v929_v11, %v931_v15  ;;  %v1018_v17 = vcombine.high %v929_v11, %v931_v15 }
 0x1ef   : > { %1031 = vst [vmem:[#allocation2 + $0x18] sm:$0xff] %v1017_v16  ;;  %1033 = vst [vmem:[#allocation2 + $0x24] sm:$0xff] %v1018_v17 }
 0x1f0 LB: >> { %v2759_v18 = vpack.c.bf16 %v3204_v37, %v3189_v34  ;;  %v2960_v19 = vmov 0.0|0.0   ;;  %v2961_v20 = vmov 0.0   ;;  %v2762_v21 = vpack.c.bf16 %v3234_v43, %v3219_v40  ;;  %s2649_s19 = smul.u32 12, %s2954_s17  ;;  %s2966_s22 = smov 32   ;;  %s2954_s17 = sphi %s3296_s17, %s1068_s17   ;;  %v2950_v53 = vphi %v1061_v53, %v3507_v53   ;;  %v2946_v54 = vphi %v1062_v54, %v3506_v54  }
 0x1f1   : >> { %2758 = vmatprep.subr.bf16.mxu1 %v2960_v19  ;;  %1147 = vmatprep.mubr.f32.mxu0 %v2961_v20  ;;  %vm2962_vm5 = vmmov 0   ;;  %v2963_v22 = vmov 1966171168   ;;  %vm1288_vm6 = vcmask 259072   ;;  %vm1323_vm7 = vcmask 1041409   ;;  %s2624_s21 = sshll.u32 %s2954_s17, 2 }
 0x1f2   : >> { %2760 = vmatpush3.bf16.msra.mxu1 %v2759_v18  ;;  %2707 = vmatprep.mubr.msk.f32.mxu1 %vm2962_vm5, %v2961_v20  ;;  %v1227_v23 = vunpack.c.l.s4 %v2963_v22  ;;  %s3316_s28 = scalar_lea.vmem [#allocation2], %s2649_s19  ;;  %vm1328_vm8 = vcmask 41984   ;;  %vm1791_vm9 = vcmask 48128   ;;  %vm1804_vm10 = vcmask 1045504   ;;  %s1077_s25 = scalar_lea.vmem %s3064_s18, %s2624_s21 }
 0x1f3   : >> { %2761 = vmatprep.subr.bf16.mxu1 %v2960_v19  ;;  %vm2200_vm11 = vcmask 1041408   ;;  %s2967_s15 = smov 64   ;;  %s2968_s30 = smov 96   ;;  %vm2338_vm15 = vcmask 254976  }
 0x1f4   : >> { %v1228_v24 = vunpack.c.0.s8 %v1227_v23  ;;  %s2340_s20 = ssub.s32 3, %s2954_s17  ;;  %s2641_s27 = sshll.u32 %s2954_s17, 1 }
 0x1f5   : >> { %s2642_s13 = sshll.u32 %s2340_s20, 1  ;;  %s2337_s14 = scalar_lea.vmem %s3069_s24, %s2641_s27 }
 0x1f6   : >> { %2763 = vmatpush3.bf16.msra.mxu1 %v2762_v21  ;;  %v1075_v25 = vld [vmem:[%s3316_s28 + $0x8] sm:$0xf]  ;;  %v1231_v56 = vsub.s32 %v1228_v24, %v3122_v63  ;;  %s2342_s16 = scalar_lea.vmem %s3074_s26, %s2642_s13  ;;  %s1068_s17 = sadd.s32 1, %s2954_s17  }
 0x1f7   : >> { %p1065_p7 = scmp.ge.s32.totalorder %s1068_s17, 4  }
 0x1f8   : > { %s2970_s29 = smov (%p1065_p7), 32   ;;  %s2971_s19 = smov (%p1065_p7), [#allocation6]   ;;  %vm2374_vm1 = vcmask (%p1065_p7), 517120  }
 0x1f9   : >> { %2708 = vmatmul.mubr.msk.f32.vlgmr.msra.gmra.mrb[0].mxu1 %vm851_vm3, %v2950_v53 }
 0x2cc   : >> { %v1220_v58 = vpop.f32.mrb[0].mxu1 }
 0x2cd   : >> { %v1224_v59 = vadd.f32 %v1220_v58, %v1075_v25  ;;  %v2709_v60 = vpop.f32.mrb[1].mxu1 }
 0x2cf   : >> { %v1232_v61 = vrot.slane %v1224_v59, %v1231_v56 }
 0x2d1   : >> { %v1233_v62 = vcombine.high %v1232_v61, %v1232_v61  ;;  %v1240_v0 = vrot.slane %v1232_v61, %v1231_v56 }
 0x2d3   : >> { %v1247_v1 = vrot.slane %v1233_v62, %v1231_v56  ;;  %v1253_v2 = vrot.slane %v1240_v0, %v3277_v55  ;;  %v1248_v3 = vcombine.high %v1240_v0, %v1240_v0  ;;  %v1306_v56 = vand.u32 127, %v794_v50 }
 0x2d5   : >> { %v1270_v4 = vadd.f32 %v1253_v2, %v3152_v26  ;;  %v1261_v5 = vrot.slane %v1248_v3, %v3277_v55  ;;  %v1257_v6 = vrot.slane %v1247_v1, %v3277_v55  ;;  %v1249_v7 = vcombine.high %v1247_v1, %v1247_v1 }
 0x2d6   : >> { %v3334_v59 = vsub.s32 %v1306_v56, %v3122_v63 }
 0x2d7   : >> { %2850 = vtanh.f32 %v1270_v4  ;;  %v1272_v8 = vadd.f32 %v1261_v5, %v3152_v26  ;;  %v1271_v9 = vadd.f32 %v1257_v6, %v3154_v27  ;;  %v1265_v10 = vrot.slane %v1249_v7, %v3277_v55 }
 0x2d9   : >> { %2852 = vtanh.f32 %v1272_v8  ;;  %v1273_v11 = vadd.f32 %v1265_v10, %v3154_v27  ;;  %v1380_v8 = vrot.slane %v3169_v30, %v3283_v57  ;;  %v2964_v10 = vmov 0  }
 0x2da   : >> { %2854 = vtanh.f32 %v1271_v9  ;;  %v1373_v9 = vrot.slane %v3169_v30, %v3277_v55  ;;  %2848 = vset.pattern.permute.xlu1 %v2964_v10  ;;  %2849 = vset.pattern.permute.xlu0 %v2964_v10 }
 0x2db   : >> { %2856 = vtanh.f32 %v1273_v11 }
 0x2e1   : >> { %v2851_v13 = vpop.eup %2850 }
 0x2e2   : >> { %v1284_v14 = vmul.f32 %v2851_v13, %v3174_v31 }
 0x2e3   : >> { %v2853_v15 = vpop.eup %2852 }
 0x2e4   : >> { %v2855_v16 = vpop.eup %2854  ;;  %v1289_v17 = vsel %vm1288_vm6, %v1284_v14, 0.0  ;;  %v1286_v18 = vmul.f32 %v2853_v15, %v3174_v31 }
 0x2e5   : >> { %v2857_v19 = vpop.eup %2856  ;;  %1290 = vadd.xlane.f32.xlu0 %v1289_v17  ;;  %v1285_v21 = vmul.f32 %v2855_v16, %v3174_v31 }
 0x2e6   : >> { %v1295_v22 = vsel %vm1288_vm6, %v1286_v18, 0.0  ;;  %v1287_v23 = vmul.f32 %v2857_v19, %v3174_v31 }
 0x2e7   : >> { %1296 = vadd.xlane.f32.xlu1 %v1295_v22  ;;  %v1292_v24 = vsel %vm1288_vm6, %v1285_v21, 0.0 }
 0x2e8   : >> { %v1298_v25 = vsel %vm1288_vm6, %v1287_v23, 0.0 }
 0x2e9   : >> { %1293 = vadd.xlane.f32.xlu0 %v1292_v24 }
 0x2eb   : >> { %1299 = vadd.xlane.f32.xlu1 %v1298_v25 }
 0x372   : >> { %v1291_v58 = vpop.xlane.xlu0 %1290 }
 0x373   : >> { %v1310_v62 = vrot.slane %v1291_v58, %v3334_v59 }
 0x374   : >> { %v1297_v60 = vpop.xlane.xlu1 %1296 }
 0x375   : >> { %v1318_v2 = vrot.slane %v1297_v60, %v3334_v59 }
 0x376   : >> { %v1294_v61 = vpop.xlane.xlu0 %1293 }
 0x377   : >> { %v1314_v0 = vrot.slane %v1294_v61, %v3334_v59 }
 0x378   : >> { %v1300_v1 = vpop.xlane.xlu1 %1299 }
 0x379   : >> { %v1322_v3 = vrot.slane %v1300_v1, %v3334_v59  ;;  %v1324_v4 = vsel %vm1323_vm7, %v1314_v0, %v1310_v62 }
 0x37a   : >> { %v1329_v5 = vsel %vm1328_vm8, %v1324_v4, -inf }
 0x37b   : >> { %1330 = vmax.xlane.f32.xlu0 %v1329_v5  ;;  %v1325_v6 = vsel %vm1323_vm7, %v1322_v3, %v1318_v2 }
 0x37c   : >> { %v1332_v7 = vsel %vm1328_vm8, %v1325_v6, -inf }
 0x37d   : >> { %1333 = vmax.xlane.f32.xlu1 %v1332_v7 }
 0x38e   : >> { %1382 = vbcast.lane.b32.xlu1 %v1380_v8, 256 }
 0x391   : >> { %1375 = vbcast.lane.b32.xlu0 %v1373_v9, 256 }
 0x408   : >> { %v1331_v11 = vpop.xlane.xlu0 %1330 }
 0x409   : >> { %v1340_v13 = vrot.slane %v1331_v11, %v3277_v55  ;;  %v1344_v14 = vrot.slane %v1331_v11, %v3283_v57 }
 0x40a   : >> { %v1334_v15 = vpop.xlane.xlu1 %1333 }
 0x40b   : >> { %v1357_v16 = vsub.f32 %v1291_v58, %v1340_v13  ;;  %v1358_v17 = vsub.f32 %v1294_v61, %v1344_v14  ;;  %v1348_v18 = vrot.slane %v1334_v15, %v3277_v55  ;;  %v1352_v19 = vrot.slane %v1334_v15, %v3283_v57 }
 0x40c   : >> { %v1376_v62 = vpop.permute.xlu0 %1375 }
 0x40d   : >> { %v1361_v21 = vmul.f32 1.442695, %v1357_v16  ;;  %v1363_v22 = vmul.f32 1.442695, %v1358_v17  ;;  %v1359_v23 = vsub.f32 %v1297_v60, %v1348_v18  ;;  %v1360_v24 = vsub.f32 %v1300_v1, %v1352_v19 }
 0x40e   : >> { %v1383_v61 = vpop.permute.xlu1 %1382  ;;  %v2965_v18 = vmov 1934713408  }
 0x40f   : >> { %2858 = vpow2.f32 %v1361_v21  ;;  %v1365_v25 = vmul.f32 1.442695, %v1359_v23  ;;  %v1367_v56 = vmul.f32 1.442695, %v1360_v24  ;;  %v1509_v19 = vunpack.c.l.s4 %v2965_v18 }
 0x410   : >> { %2860 = vpow2.f32 %v1363_v22 }
 0x411   : >> { %2862 = vpow2.f32 %v1365_v25  ;;  %v1510_v22 = vunpack.c.0.s8 %v1509_v19 }
 0x412   : >> { %2864 = vpow2.f32 %v1367_v56 }
 0x413   : >> { %v3363_v56 = vsub.s32 %v1510_v22, %v3122_v63 }
 0x419   : >> { %v2859_v0 = vpop.eup %2858 }
 0x41a   : >> { %v2861_v2 = vpop.eup %2860  ;;  %v1386_v3 = vmul.f32 %v2859_v0, %v1376_v62 }
 0x41b   : >> { %v2863_v58 = vpop.eup %2862  ;;  %v1387_v5 = vmul.f32 %v2861_v2, %v1383_v61 }
 0x41c   : >> { %v1388_v4 = vmul.f32 %v2863_v58, %v1376_v62  ;;  %1395 = vperm.xlu1 %2848, %v1386_v3   ;;  %v2865_v6 = vpop.eup %2864 }
 0x41d   : >> { %v1389_v60 = vmul.f32 %v2865_v6, %v1383_v61  ;;  %v2750_v6 = vpack.c.bf16 %v3199_v36, %v3184_v33 }
 0x41e   : >> { %1401 = vperm.xlu0 %2849, %v1388_v4  }
 0x41f   : >> { %2751 = vmatprep.subr.bf16.mxu0 %v2750_v6 }
 0x420   : >> { %1398 = vperm.xlu1 %2848, %v1387_v5  }
 0x424   : >> { %1404 = vperm.xlu1 %2848, %v1389_v60   ;;  %v2752_v60 = vpack.c.bf16 %v3194_v35, %v3179_v32 }
 0x426   : >> { %2753 = vmatpush1.bf16.msra.mxu0 %v2752_v60 }
 0x49b   : >> { %v1396_v1 = vpop.permute.xlu1 %1395 }
 0x49c   : >> { %v1409_v8 = vrot.slane %v1396_v1, %v3334_v59  ;;  %v2754_v1 = vpack.c.bf16 %v3229_v42, %v3214_v39 }
 0x49d   : >> { %v1402_v11 = vpop.permute.xlu0 %1401 }
 0x49e   : >> { %v1417_v15 = vrot.slane %v1402_v11, %v3334_v59  ;;  %2755 = vmatprep.subr.bf16.mxu0 %v2754_v1 }
 0x49f   : >> { %v1399_v7 = vpop.permute.xlu1 %1398 }
 0x4a0   : >> { %v1413_v9 = vrot.slane %v1399_v7, %v3334_v59  ;;  %v2756_v7 = vpack.c.bf16 %v3224_v41, %v3209_v38 }
 0x4a2   : >> { %v1422_v13 = vsel %vm1323_vm7, %v1413_v9, %v1409_v8  ;;  %2757 = vmatpush1.bf16.msra.mxu0 %v2756_v7 }
 0x4a3   : >> { %1426 = vxpose.xlu1.b32.start.end [1/1] (short) (narrow) %v1422_v13, 8  ;;  %v1405_v14 = vpop.permute.xlu1 %1404  ;;  %v2098_v9 = vsel %vm1328_vm8, %v1422_v13, 0.0 }
 0x4a4   : >> { %v1421_v16 = vrot.slane %v1405_v14, %v3334_v59 }
 0x4a5   : >> { %2625 = vmatmul.mubr.msk.f32.vlgmr.msra.gmra.mrb[0].mxu0 %vm851_vm3, %v2950_v53 }
 0x4a6   : >> { %v1423_v17 = vsel %vm1323_vm7, %v1421_v16, %v1417_v15 }
 0x4a7   : >> { %1458 = vxpose.xlu0.b32.start.end [1/1] (short) (narrow) %v1423_v17, 8  ;;  %v2101_v8 = vsel %vm1328_vm8, %v1423_v17, 0.0 }
 0x523   : >> { %v1442_v21 = vpop.trf.xlu1 }
 0x524   : >> { %v1496_v23 = vrot.slane %v1442_v21, %v3138_v12 }
 0x527   : >> { %v1474_v24 = vpop.trf.xlu0 }
 0x528   : >> { %v1504_v25 = vrot.slane %v1474_v24, %v3138_v12  ;;  %v2628_v2 = vcombine.high %v1442_v21, %v1474_v24 }
 0x52a   : >> { %v1506_v62 = vcombine.low %v1496_v23, %v1504_v25  ;;  %v1507_v0 = vcombine.high %v1496_v23, %v1504_v25  ;;  %v1529_v58 = vrot.slane %v2628_v2, %v3363_v56 }
 0x52c   : >> { %v1521_v59 = vrot.slane %v1507_v0, %v3363_v56  ;;  %v1514_v3 = vrot.slane %v1506_v62, %v3363_v56  ;;  %v1532_v4 = vcombine.high %v1529_v58, %v2961_v20 }
 0x52e   : >> { %1533 = vxpose.xlu0.b32.start.end [1/1] (short) (narrow) %v1514_v3, 8  ;;  %v1531_v61 = vcombine.high %v1521_v59, %v2961_v20  ;;  %v1530_v5 = vcombine.high %v1514_v3, %v2961_v20 }
 0x530   : >> { %1629 = vxpose.xlu1.b32.start.end [1/1] (short) (narrow) %v1531_v61, 8 }
 0x532   : >> { %1597 = vxpose.xlu0.b32.start.end [1/1] (short) (narrow) %v1521_v59, 8 }
 0x534   : >> { %1693 = vxpose.xlu1.b32.start.end [1/1] (short) (narrow) %v1532_v4, 8 }
 0x536   : >> { %1565 = vxpose.xlu0.b32.start.end [1/1] (short) (narrow) %v1530_v5, 8 }
 0x538   : >> { %1893 = vxpose.xlu1.b32.start.end [1/1] (short) (narrow) %v3164_v29, 32 }
 0x53a   : >> { %1661 = vxpose.xlu0.b32.start.end [1/1] (short) (narrow) %v1529_v58, 8 }
 0x53e   : >> { %1759 = vxpose.xlu0.b32.start.end [1/1] (short) (narrow) %v3159_v28, 32 }
 0x56b   : >> { %2102 = vadd.xlane.f32.xlu1 %v2101_v8 }
 0x577   : >> { %2099 = vadd.xlane.f32.xlu0 %v2098_v9 }
 0x5ae   : >> { %v1549_v11 = vpop.trf.xlu0 }
 0x5b0   : >> { %v1645_v14 = vpop.trf.xlu1 }
 0x5b2   : >> { %v1613_v15 = vpop.trf.xlu0 }
 0x5b3   : >> { %v1725_v18 = vcombine.low %v1549_v11, %v1613_v15  ;;  %v2764_v15 = vpack.c.bf16 %v3254_v47, %v3244_v45 }
 0x5b4   : >> { %v1709_v16 = vpop.trf.xlu1 }
 0x5b5   : >> { %v1732_v23 = vrot.slane %v1725_v18, %v3138_v12 }
 0x5b6   : >> { %v1581_v19 = vpop.trf.xlu0 }
 0x5b7   : >> { %v1733_v21 = vcombine.low %v1581_v19, %v1645_v14 }
 0x5b8   : >> { %v1909_v22 = vpop.trf.xlu1 }
 0x5b9   : >> { %v1740_v24 = vrot.slane %v1733_v21, %v3138_v12  ;;  %2720 = vmatprep.mubr.msk.f32.mxu1 %vm1791_vm9, %v1909_v22  ;;  %v2768_v21 = vpack.c.bf16 %v3274_v52, %v3264_v49  ;;  %v2770_v22 = vpack.c.bf16 %v3269_v51, %v3259_v48 }
 0x5ba   : >> { %v1677_v17 = vpop.trf.xlu0 }
 0x5bb   : >> { %v1741_v25 = vcombine.low %v1732_v23, %v1740_v24  ;;  %v1749_v62 = vcombine.low %v1677_v17, %v1709_v16  ;;  %v2766_v16 = vpack.c.bf16 %v3249_v46, %v3239_v44 }
 0x5bc   : >> { %v1910_v13 = vpop.trf.xlu1 }
 0x5bd   : >> { %v1748_v0 = vrot.slane %v1741_v25, %v3363_v56  ;;  %v1756_v2 = vrot.slane %v1749_v62, %v3363_v56 }
 0x5be   : >> { %v1775_v59 = vpop.trf.xlu0 }
 0x5bf   : >> { %v1757_v3 = vcombine.low %v1748_v0, %v1756_v2  ;;  %v1758_v58 = vcombine.high %v1748_v0, %v1756_v2  ;;  %2712 = vmatprep.mubr.msk.f32.mxu0 %vm1791_vm9, %v1775_v59 }
 0x5c0   : >> { %v1911_v61 = vpop.trf.xlu1 }
 0x5c1   : >> { %2710 = vmatprep.subr.msk.mxu0 %vm1804_vm10, %v1757_v3  ;;  %2718 = vmatprep.subr.msk.mxu1 %vm1804_vm10, %v1758_v58 }
 0x5c2   : >> { %2719 = vmatpush3.msk.msra.mxu1 %vm1804_vm10, %v1758_v58  ;;  %v1776_v4 = vpop.trf.xlu0  ;;  %2711 = vmatpush3.msk.msra.mxu0 %vm1804_vm10, %v1757_v3 }
 0x5c3   : >> { %2713 = vmatmul.mubr.msk.f32.vlgmr.msra.gmra.mrb[2].mxu0 %vm1791_vm9, %v1776_v4  ;;  %2721 = vmatmul.mubr.msk.f32.vlgmr.msra.gmra.mrb[2].mxu1 %vm1791_vm9, %v1910_v13 }
 0x5c4   : >> { %v1912_v5 = vpop.trf.xlu1  ;;  %2723 = vmatprep.mubr.msk.f32.mxu1 %vm1791_vm9, %v1911_v61  ;;  %2765 = vmatprep.subr.bf16.mxu0 %v2764_v15 }
 0x5c5   : >> { %2767 = vmatpush1.bf16.msra.mxu0 %v2766_v16 }
 0x5c6   : >> { %v1777_v6 = vpop.trf.xlu0  ;;  %2769 = vmatprep.subr.bf16.mxu0 %v2768_v21 }
 0x5c7   : >> { %2715 = vmatprep.mubr.msk.f32.mxu0 %vm1791_vm9, %v1777_v6  ;;  %2724 = vmatmul.mubr.msk.f32.gmra.mrb[4].mxu1 %vm1791_vm9, %v1912_v5 }
 0x5c9   : >> { %2771 = vmatpush1.bf16.msra.mxu0 %v2770_v22 }
 0x5ca   : >> { %v1778_v60 = vpop.trf.xlu0 }
 0x5cb   : >> { %2716 = vmatmul.mubr.msk.f32.gmra.mrb[4].mxu0 %vm1791_vm9, %v1778_v60  ;;  %v1074_v60 = vld [vmem:[%s3316_s28] sm:$0xff]  ;;  %s2411_s28 = sshll.u32 (%p1065_p7), %s2971_s19, 4  ;;  %s2412_s28 = int_to_ptr.vmem [resolvable:$true] %s2411_s28 }
 0x5cc   : >> { %2186 = vmatprep.mubr.f32.mxu0 %v2961_v20  ;;  %s2878_s24 = scalar_lea.vmem (%p1065_p7), %s2412_s28, 32  ;;  %p2885_p12 = scmp.lt.s32.totalorder (%p1065_p7), %s2412_s28, %s2412_s28 }
 0x5cd   : > { %p2879_p9 = scmp.ne.s32.totalorder (%p1065_p7), %s2412_s28, %s2878_s24  ;;  %p2886_p13 = scmp.lt.s32.totalorder (%p1065_p7), %s2878_s24, %s2878_s24 }
 0x5cf   : > { %p2887_p0 = por (%p1065_p7), %p2886_p13, %p2885_p12 }
 0x5f8   : >> { %v2103_v23 = vpop.xlane.xlu1 %2102 }
 0x5f9   : >> { %v2105_v17 = vadd.f32 1e-06, %v2103_v23 }
 0x5fb   : >> { %2866 = vrcp.f32 %v2105_v17 }
 0x604   : >> { %v2100_v24 = vpop.xlane.xlu0 %2099 }
 0x605   : >> { %v2104_v25 = vadd.f32 1e-06, %v2100_v24  ;;  %v2867_v59 = vpop.eup %2866 }
 0x607   : >> { %2868 = vrcp.f32 %v2104_v25 }
 0x611   : >> { %v2869_v58 = vpop.eup %2868 }
 0x696   : >> { %v2714_v1 = vpop.f32.mrb[2].mxu0  ;;  %v2722_v7 = vpop.f32.mrb[2].mxu1 }
 0x697   : >> { %v1874_v8 = vpop.f32.mrb[3].mxu0  ;;  %v2006_v9 = vpop.f32.mrb[3].mxu1 }
 0x698   : >> { %2057 = vxpose.xlu0.b32.start [1/4] (short) (narrow) %v2006_v9, 8  ;;  %2025 = vxpose.xlu1.b32.start [1/4] (short) (narrow) %v1874_v8, 8 }
 0x69a   : >> { %v2725_v11 = vpop.f32.mrb[4].mxu1 }
 0x69b   : >> { %v2016_v14 = vpop.f32.mrb[5].mxu1 }
 0x69c   : >> { %2058 = vxpose.xlu0.b32.cont [2/4] (short) (narrow) %v2722_v7, 8  ;;  %2026 = vxpose.xlu1.b32.cont [2/4] (short) (narrow) %v2714_v1, 8  ;;  %v2196_v1 = vrot.slane %v1074_v60, 4 }
 0x69e   : >> { %v2717_v18 = vpop.f32.mrb[4].mxu0 }
 0x69f   : >> { %v1884_v19 = vpop.f32.mrb[5].mxu0 }
 0x6a0   : >> { %2059 = vxpose.xlu0.b32.cont [3/4] (short) (narrow) %v2016_v14, 8  ;;  %2027 = vxpose.xlu1.b32.cont [3/4] (short) (narrow) %v1884_v19, 8 }
 0x6a4   : >> { %2060 = vxpose.xlu0.b32.end [4/4] (short) (narrow) %v2725_v11, 8  ;;  %2028 = vxpose.xlu1.b32.end [4/4] (short) (narrow) %v2717_v18, 8 }
 0x6c2   : >> { %2210 = vrot.lane.b32.xlu1 %v2946_v54, %s2966_s22 }
 0x718   : >> { %v2073_v62 = vpop.trf.xlu0  ;;  %v2041_v13 = vpop.trf.xlu1 }
 0x719   : >> { %v2089_v0 = vcombine.low %v2041_v13, %v2073_v62  ;;  %v1078_v13 = vld [vmem:[%s1077_s25] sm:$0x3] }
 0x71a   : >> { %vm2230_vm13 = vcmp.gt.f32.partialorder %v1078_v13, 0.0 }
 0x71b   : >> { %v2096_v2 = vrot.slane %v2089_v0, %v3363_v56 }
 0x71d   : >> { %v2097_v3 = vcombine.high %v2096_v2, %v2961_v20  ;;  %v2108_v61 = vmul.f32 %v2869_v58, %v2096_v2  ;;  %v1079_v20 = vld [vmem:[%s1077_s25 + $0x2] sm:$0x3]  ;;  %v2232_v2 = vsel %vm2230_vm13, 1, %v2964_v10 }
 0x71e   : >> { %vm2231_vm12 = vcmp.gt.f32.partialorder %v1079_v20, 0.0 }
 0x71f   : >> { %v2109_v4 = vmul.f32 %v2867_v59, %v2097_v3  ;;  %v2233_v15 = vsel %vm2231_vm12, 1, %v2964_v10 }
 0x721   : >> { %v2112_v5 = vcombine.low %v2108_v61, %v2109_v4 }
 0x723   : >> { %v2119_v6 = vrot.slane %v2112_v5, %v3138_v12 }
 0x725   : >> { %2639 = vmatmul.mubr.msk.f32.vlgmr.msra.gmra.mrb[0].mxu0 %vm851_vm3, %v2119_v6  ;;  %v2969_v6 = vmov 269488144  }
 0x726   : >> { %v2238_v10 = vunpack.c.l.s4 %v2969_v6 }
 0x734   : >> { %v2211_v24 = vpop.permute.xlu1 %2210 }
 0x7f8   : >> { %v2188_v7 = vpop.f32.mrb[0].mxu0 }
 0x7f9   : >> { %v2772_v8 = vadd.f32 %v2188_v7, %v1074_v60  ;;  %v2190_v9 = vpop.f32.mrb[1].mxu0  ;;  %v2239_v60 = vunpack.c.0.s8 %v2238_v10 }
 0x7fa   : >> { %v2773_v56 = vadd.f32 %v2196_v1, %v2190_v9  ;;  %v2277_v9 = vrot.slane %v2950_v53, %v3138_v12 }
 0x7fc   : >> { %v2201_v11 = vsel %vm2200_vm11, %v2772_v8, %v2773_v56  ;;  %v2242_v8 = vsub.s32 %v2239_v60, %v3122_v63 }
 0x7fd   : >> { %2870 = vtanh.f32 %v2201_v11  ;;  %v2640_v16 = vmul.f32 -1.442695, %v2201_v11 }
 0x7ff   : >> { %2872 = vpow2.f32 %v2640_v16  ;;  %v2304_v16 = vrot.slane %v2946_v54, %v3138_v12 }
 0x807   : >> { %v2871_v14 = vpop.eup %2870 }
 0x808   : >> { %2215 = vrot.lane.b32.xlu0 %v2871_v14, %s2966_s22 }
 0x809   : >> { %v2873_v18 = vpop.eup %2872 }
 0x80a   : >> { %v2205_v19 = vadd.f32 1.0, %v2873_v18 }
 0x80c   : >> { %2245 = vperm.xlu0 %2849, %v2233_v15   ;;  %2874 = vrcp.f32 %v2205_v19  ;;  %v2278_v15 = vcombine.high %v2277_v9, %v2277_v9 }
 0x810   : >> { %2324 = vperm.xlu0 %2849, %v1079_v20  }
 0x816   : >> { %v2875_v21 = vpop.eup %2874 }
 0x817   : >> { %v2213_v17 = vmul.f32 %v2875_v21, %v2211_v24 }
 0x87a   : >> { %v2216_v22 = vpop.permute.xlu0 %2215 }
 0x87b   : >> { %v2218_v23 = vmul.f32 %v2875_v21, %v2216_v22 }
 0x87d   : >> { %2220 = vrot.lane.b32.xlu1 %v2218_v23, %s2966_s22 }
 0x88b   : >> { %v2246_v7 = vpop.permute.xlu0 %2245 }
 0x88c   : >> { %v2253_v20 = vrot.slane %v2246_v7, %v2242_v8 }
 0x88e   : >> { %vm2255_vm0 = vcmp.eq.s32.totalorder %v2253_v20, 1 }
 0x88f   : >> { %v2325_v14 = vpop.permute.xlu0 %2324 }
 0x890   : >> { %v2333_v22 = vrot.slane %v2325_v14, %v2242_v8 }
 0x8ef   : >> { %v2221_v25 = vpop.permute.xlu1 %2220 }
 0x8f0   : >> { %v2223_v62 = vadd.f32 %v2221_v25, %v2213_v17  ;;  %v2305_v17 = vcombine.high %v2304_v16, %v2304_v16 }
 0x8f2   : >> { %2876 = vtanh.f32 %v2223_v62  ;;  %v2290_v61 = vrot.slane %v2223_v62, %v3138_v12 }
 0x8f4   : >> { %v2291_v5 = vcombine.high %v2290_v61, %v2290_v61 }
 0x8fc   : >> { %v2877_v0 = vpop.eup %2876 }
 0x8fd   : >> { %2226 = vrot.lane.b32.xlu1 %v2877_v0, %s2966_s22  ;;  %s3508_s22 = sadd.s32 (%p1065_p7), 4294967295, %s2942_s23  }
 0x8fe   : > { %p3452_p8 = scmp.eq.s32.totalorder (%p1065_p7), %s3508_s22, 1 }
 0x900   : > { %p2880_p10 = pnand (%p1065_p7), %p2879_p9, %p3452_p8 }
 0x901   : >> { %2235 = vperm.xlu1 %2848, %v2232_v2  }
 0x902   : > { %p2881_p11 = pneg (%p1065_p7), %p2880_p10 }
 0x904   : > { %p2888_p1 = pnand (%p1065_p7), %p2887_p0, %p2881_p11 }
 0x905   : >> { %2312 = vperm.xlu1 %2848, %v1078_v13  }
 0x96f   : >> { %v2227_v59 = vpop.permute.xlu1 %2226 }
 0x970   : >> { %v2229_v3 = vmul.f32 %v2875_v21, %v2227_v59 }
 0x972   : >> { %v2263_v58 = vrot.slane %v2229_v3, %v3138_v12 }
 0x974   : >> { %v2264_v4 = vcombine.high %v2263_v58, %v2263_v58  ;;  %2265 = vrot.lane.b32.xlu1 %v2263_v58, %s2967_s15 }
 0x976   : >> { %2267 = vrot.lane.b32.xlu0 %v2264_v4, %s2967_s15 }
 0x978   : >> { %2292 = vrot.lane.b32.xlu1 %v2290_v61, %s2968_s30 }
 0x97a   : >> { %2294 = vrot.lane.b32.xlu0 %v2291_v5, %s2968_s30 }
 0x980   : >> { %v2236_v1 = vpop.permute.xlu1 %2235 }
 0x981   : >> { %v2243_v56 = vrot.slane %v2236_v1, %v2242_v8 }
 0x983   : >> { %vm3429_vm14 = vcmp.eq.s32.totalorder %v2243_v56, 1 }
 0x984   : >> { %v2313_v11 = vpop.permute.xlu1 %2312 }
 0x985   : >> { %v2321_v19 = vrot.slane %v2313_v11, %v2242_v8 }
 0x9e6   : >> { %v2266_v21 = vpop.permute.xlu1 %2265 }
 0x9e7   : >> { %v2281_v53 = vsel %vm3429_vm14, %v2266_v21, %v2277_v9 }
 0x9e8   : >> { %v2334_v23 = vmul.f32 %v2321_v19, %v2281_v53  ;;  %v2268_v24 = vpop.permute.xlu0 %2267 }
 0x9e9   : >> { %v2282_v25 = vsel %vm2255_vm0, %v2268_v24, %v2278_v15 }
 0x9ea   : >> { %2339 = vst.msk [vmem:[%s2337_s14] sm:$0x3] %vm2338_vm15, %v2334_v23  ;;  %v2335_v54 = vmul.f32 %v2333_v22, %v2282_v25  ;;  %v2346_v62 = vcombine.low %v2281_v53, %v2282_v25  ;;  %v2293_v13 = vpop.permute.xlu1 %2292 }
 0x9eb   : >> { %v2308_v59 = vsel %vm3429_vm14, %v2293_v13, %v2304_v16 }
 0x9ec   : >> { %2343 = vst.msk [vmem:[%s2342_s16] sm:$0x3] %vm2338_vm15, %v2335_v54  ;;  %v2353_v0 = vrot.slane %v2346_v62, %v3138_v12   ;;  %v2295_v2 = vpop.permute.xlu0 %2294  ;;  %1067 = sbr.rel (!%p1065_p7) target bundleno = 496 (0x1f0), region = 136 }
 0x9ed   : >> { %v2309_v3 = vsel %vm2255_vm0, %v2295_v2, %v2305_v17 }
 0x9ee   : >> { %v2357_v58 = vcombine.low %v2308_v59, %v2309_v3  ;;  %v3507_v53 = vmov %v2353_v0  ;;  %2366 = vst.msk [vmem:[#allocation4] sm:$0xf] (%p1065_p7), %vm1027_vm4, %v2353_v0  ;;  %v2369_v4 = vrot.slane (%p1065_p7), %v2353_v0, 2 }
 0x9f0   : >> { %v2364_v61 = vrot.slane %v2357_v58, %v3138_v12   ;;  %2370 = vrot.lane.b32.xlu0 (%p1065_p7), %v2369_v4, %s2970_s29 }
 0x9f2   : >> { %v3506_v54 = vmov %v2364_v61  ;;  %2367 = vst.msk [vmem:[#allocation5] sm:$0xf] (%p1065_p7), %vm1027_vm4, %v2364_v61 }
 0xa62   : > { %v2371_v5 = vpop.permute.xlu0 %2370 }
 0xa63   : > { %v2373_v50 = vsel %vm851_vm3, %v2353_v0, %v2371_v5 }
 0xa64   : > { %2375 = vst.msk [vmem:[#allocation6] sm:$0x3] %vm2374_vm1, %v2373_v50 }
 0xa65   : > { %2891 = shalt.err (!%p2888_p1)
}
 0xa66   : > { %s2892_s17 = scalar_lea.hbm %s3500_s12, 32 }
 0xa67   : > { %p2893_p2 = scmp.ne.s32.totalorder %s3500_s12, %s2892_s17  ;;  %p2898_p5 = scmp.lt.u32.totalorder %s2892_s17, %s3500_s12 }
 0xa69   : > { %p2894_p3 = pnand %p2893_p2, %p3452_p8 }
 0xa6b   : > { %p2895_p4 = pneg %p2894_p3 }
 0xa6d   : > { %p2900_p6 = pnand %p2898_p5, %p2895_p4 }
 0xa6f   : > { %2903 = shalt.err (!%p2900_p6)
}
 0xa70   : > { %2777 = dma.vmem_to_hbm [thread:$0]  (%p3452_p8), %s2412_s28, 32, %s3500_s12, [#allocation7]  }
 0xa71   : > { %2929 = dma.done.wait (%p3452_p8), [#allocation7], 32  }
 0xa72   : > { %2931 = vsyncadd (%p3452_p8), [#allocation7], 4294967264 }
 0xa73 PF: > { %s24_s23 = sadd.s32 1, %s2942_s23   ;;  %s3510_s21 = sld [smem:[#allocation9_spill]] }
 0xa74   : > { %p21_p7 = scmp.ge.s32.totalorder %s24_s23, 4   ;;  %s3511_s22 = sld [smem:[#allocation10_spill]] }
 0xa76   :  { %23 = sbr.rel (!%p21_p7) target bundleno = 2 (0x2), region = 147 }
 0xa7d   :  { %2447 = vsyncpa [#allocation7], 1 }
 0xa7e   :  { %2449 = vsyncpa [#allocation7 + $0x1], 1 }

</bundles_post_ra>
